<compile_context>
chip_gen: v7x
topology: tpu7x:2x2x1
jax: 0.10.0
libtpu: 0.0.40
codegen_flags: <defaults>
</compile_context>

<pallas_src>
import functools

import jax
import jax.numpy as jnp
from jax.experimental import pallas as pl
from jax.experimental.pallas import tpu as pltpu

# ----------------------- mini-BERT configuration ---------------------------
BATCH, SEQ = 2, 8
HIDDEN, HEADS, FFN, LAYERS = 32, 4, 64, 2
HEAD_DIM = HIDDEN // HEADS
VOCAB, TYPE_VOCAB, MAX_POS = 30, 2, 16
LN_EPS = 1e-12
OUT_DIM = 1


# ----------------------------- kernel helpers -------------------------------
def _gelu_tanh(x):
    # TODO(synk): HF BERT uses exact erf-GELU; tanh approximation used here.
    c = jnp.sqrt(2.0 / jnp.pi).astype(x.dtype)
    return 0.5 * x * (1.0 + jnp.tanh(c * (x + 0.044715 * x * x * x)))


def _layer_norm(h, g, b):
    mean = jnp.mean(h, axis=-1, keepdims=True)
    var = jnp.mean((h - mean) ** 2, axis=-1, keepdims=True)
    return (h - mean) * jax.lax.rsqrt(var + LN_EPS) * g + b


# ---------------------- kernel 1: embedding LayerNorm -----------------------
# (plain LN -- no fake zero residual tensor)
def emb_ln_kernel(x_ref, g_ref, b_ref, o_ref):
    o_ref[...] = _layer_norm(x_ref[...], g_ref[...], b_ref[...])


def embedding_layer_norm(x, gamma, beta):
    M, H = x.shape
    return pl.pallas_call(
        emb_ln_kernel,
        out_shape=jax.ShapeDtypeStruct((M, H), jnp.float32),
    )(x, gamma.reshape(1, H), beta.reshape(1, H))


# ------------------ kernel 2: fully fused encoder layer ---------------------
def encoder_layer_kernel(x_ref, bias_ref, wqkv_ref, bqkv_ref, wo_ref, bo_ref,
                         ln1_g_ref, ln1_b_ref, w1_ref, b1_ref, w2_ref, b2_ref,
                         ln2_g_ref, ln2_b_ref, o_ref, ctx_ref,
                         *, batch, seq, heads, head_dim):
    hidden = heads * head_dim
    x = x_ref[...]                                            # (B*S, H)

    # Fused QKV projection -> (B*S, 3H), laid out [q | k | v] along lanes.
    qkv = (jnp.dot(x, wqkv_ref[...], preferred_element_type=jnp.float32)
           + bqkv_ref[...])
    scale = 1.0 / jnp.sqrt(jnp.float32(head_dim))

    # Per-(batch, head) attention on 2-D tiles.  Heads/batches are static
    # slices of the fused QKV activation, so there are no wrapper-side
    # transposes and no (B*H, S, S) mask tensor is ever materialized:
    # the (B, S) additive bias is broadcast in-kernel.
    for b in range(batch):
        rows = slice(b * seq, (b + 1) * seq)
        bias_b = bias_ref[b:b + 1, :]                         # (1, S)
        for h in range(heads):
            q = qkv[rows, h * head_dim:(h + 1) * head_dim]                  # (S, Dh)
            k = qkv[rows, hidden + h * head_dim:hidden + (h + 1) * head_dim]
            v = qkv[rows, 2 * hidden + h * head_dim:2 * hidden + (h + 1) * head_dim]
            s = jnp.dot(q, k.T, preferred_element_type=jnp.float32) * scale + bias_b
            m = jnp.max(s, axis=-1, keepdims=True)
            p = jnp.exp(s - m)
            l = jnp.sum(p, axis=-1, keepdims=True)
            ctx_ref[rows, h * head_dim:(h + 1) * head_dim] = jnp.dot(
                p / l, v, preferred_element_type=jnp.float32)

    ctx = ctx_ref[...]                                        # (B*S, H)
    attn_out = (jnp.dot(ctx, wo_ref[...], preferred_element_type=jnp.float32)
                + bo_ref[...])
    # attention-output dropout == identity (eval mode)
    h1 = _layer_norm(attn_out + x, ln1_g_ref[...], ln1_b_ref[...])

    inter = _gelu_tanh(jnp.dot(h1, w1_ref[...],
                               preferred_element_type=jnp.float32) + b1_ref[...])
    ffn_out = (jnp.dot(inter, w2_ref[...], preferred_element_type=jnp.float32)
               + b2_ref[...])
    # FFN-output dropout == identity (eval mode)
    o_ref[...] = _layer_norm(ffn_out + h1, ln2_g_ref[...], ln2_b_ref[...])


def encoder_layer(x, bias, lyr):
    M, H = x.shape
    kernel = functools.partial(encoder_layer_kernel, batch=BATCH, seq=SEQ,
                               heads=HEADS, head_dim=HEAD_DIM)
    return pl.pallas_call(
        kernel,
        out_shape=jax.ShapeDtypeStruct((M, H), jnp.float32),
        scratch_shapes=[pltpu.VMEM((M, H), jnp.float32)],
    )(x, bias,
      lyr["wqkv"], lyr["bqkv"].reshape(1, 3 * HIDDEN),
      lyr["wo"], lyr["bo"].reshape(1, HIDDEN),
      lyr["ln1_g"].reshape(1, HIDDEN), lyr["ln1_b"].reshape(1, HIDDEN),
      lyr["w1"], lyr["b1"].reshape(1, FFN),
      lyr["w2"], lyr["b2"].reshape(1, HIDDEN),
      lyr["ln2_g"].reshape(1, HIDDEN), lyr["ln2_b"].reshape(1, HIDDEN))


# ------------- kernel 3: fused pooler (tanh) + 1-unit classifier -------------
def head_kernel(cls_ref, pw_ref, pb_ref, ow_ref, ob_ref, o_ref):
    pooled = jnp.tanh(
        jnp.dot(cls_ref[...], pw_ref[...], preferred_element_type=jnp.float32)
        + pb_ref[...])
    # self.bert_drop = nn.Dropout(0.3) -> identity at inference (eval mode)
    o_ref[...] = (jnp.dot(pooled, ow_ref[...], preferred_element_type=jnp.float32)
                  + ob_ref[...])


def pooler_classifier(cls, pool_w, pool_b, out_w, out_b):
    B = cls.shape[0]
    return pl.pallas_call(
        head_kernel,
        out_shape=jax.ShapeDtypeStruct((B, OUT_DIM), jnp.float32),
    )(cls, pool_w, pool_b.reshape(1, HIDDEN), out_w, out_b.reshape(1, OUT_DIM))


# ---------------------------- parameter setup --------------------------------
def init_params(key):
    keys = iter(jax.random.split(key, 32))

    def w(shape):
        return 0.02 * jax.random.normal(next(keys), shape, jnp.float32)

    params = {
        "word_emb": w((VOCAB, HIDDEN)),
        "pos_emb": w((MAX_POS, HIDDEN)),
        "type_emb": w((TYPE_VOCAB, HIDDEN)),
        "emb_ln_g": jnp.ones((HIDDEN,), jnp.float32),
        "emb_ln_b": jnp.zeros((HIDDEN,), jnp.float32),
        "layers": [],
        "pool_w": w((HIDDEN, HIDDEN)),
        "pool_b": jnp.zeros((HIDDEN,), jnp.float32),
        "out_w": w((HIDDEN, OUT_DIM)),
        "out_b": jnp.zeros((OUT_DIM,), jnp.float32),
    }
    for _ in range(LAYERS):
        params["layers"].append({
            # fused QKV weight, laid out [wq | wk | wv] along the output axis
            "wqkv": w((HIDDEN, 3 * HIDDEN)),
            "bqkv": jnp.zeros((3 * HIDDEN,), jnp.float32),
            "wo": w((HIDDEN, HIDDEN)), "bo": jnp.zeros((HIDDEN,), jnp.float32),
            "ln1_g": jnp.ones((HIDDEN,), jnp.float32),
            "ln1_b": jnp.zeros((HIDDEN,), jnp.float32),
            "w1": w((HIDDEN, FFN)), "b1": jnp.zeros((FFN,), jnp.float32),
            "w2": w((FFN, HIDDEN)), "b2": jnp.zeros((HIDDEN,), jnp.float32),
            "ln2_g": jnp.ones((HIDDEN,), jnp.float32),
            "ln2_b": jnp.zeros((HIDDEN,), jnp.float32),
        })
    return params


# ------------------------------ forward pass ---------------------------------
def bert_base_uncased_forward(params, ids, mask, token_type_ids):
    B, S = ids.shape

    # Embedding gathers are plain-JAX glue; LayerNorm runs in Pallas.
    pos = jnp.arange(S, dtype=jnp.int32)
    emb = (params["word_emb"][ids]
           + params["pos_emb"][pos][None, :, :]
           + params["type_emb"][token_type_ids])
    x = emb.reshape(B * S, HIDDEN)
    x = embedding_layer_norm(x, params["emb_ln_g"], params["emb_ln_b"])

    # HF-style additive attention bias, kept at (B, S); broadcast in-kernel.
    bias = (1.0 - mask.astype(jnp.float32)) * -10000.0

    for lyr in params["layers"]:
        x = encoder_layer(x, bias, lyr)

    cls = x.reshape(B, S, HIDDEN)[:, 0, :]                    # (B, HIDDEN)
    logits = pooler_classifier(cls, params["pool_w"], params["pool_b"],
                               params["out_w"], params["out_b"])      # (B, 1)
    return logits


# ---------------------------------- main -------------------------------------
if __name__ == "__main__":
    key = jax.random.PRNGKey(0)
    pkey, ikey, mkey = jax.random.split(key, 3)

    params = init_params(pkey)

    ids = jax.random.randint(ikey, (BATCH, SEQ), 0, VOCAB, dtype=jnp.int32)
    mask = jnp.ones((BATCH, SEQ), dtype=jnp.int32).at[1, SEQ - 2:].set(0)  # some padding
    token_type_ids = jnp.zeros((BATCH, SEQ), dtype=jnp.int32).at[:, SEQ // 2:].set(1)

    fwd = jax.jit(bert_base_uncased_forward)
    out = fwd(params, ids, mask, token_type_ids)
    jax.block_until_ready(out)

    assert out.shape == (BATCH, OUT_DIM) and out.dtype == jnp.float32
    print("KERNEL_OK")
</pallas_src>

<mosaic_0001>
module attributes {stable_mosaic.version = 11 : i64} {
  func.func @emb_ln_kernel(%arg0: memref<16x32xf32, #tpu.memory_space<vmem>>, %arg1: memref<1x32xf32, #tpu.memory_space<vmem>>, %arg2: memref<1x32xf32, #tpu.memory_space<vmem>>, %arg3: memref<16x32xf32, #tpu.memory_space<vmem>>) attributes {dimension_semantics = [], scalar_prefetch = 0 : i64, scratch_operands = 0 : i64, tpu.core_type = #tpu.core_type<tc>} {
    %c0 = arith.constant 0 : index
    %c0_0 = arith.constant 0 : index
    %0 = vector.load %arg0[%c0, %c0_0] : memref<16x32xf32, #tpu.memory_space<vmem>>, vector<16x32xf32>
    %c0_1 = arith.constant 0 : index
    %c0_2 = arith.constant 0 : index
    %1 = vector.load %arg1[%c0_1, %c0_2] : memref<1x32xf32, #tpu.memory_space<vmem>>, vector<1x32xf32>
    %c0_3 = arith.constant 0 : index
    %c0_4 = arith.constant 0 : index
    %2 = vector.load %arg2[%c0_3, %c0_4] : memref<1x32xf32, #tpu.memory_space<vmem>>, vector<1x32xf32>
    %cst = arith.constant dense<0.000000e+00> : vector<16xf32>
    %3 = vector.multi_reduction <add>, %0, %cst [1] : vector<16x32xf32> to vector<16xf32>
    %4 = vector.shape_cast %3 : vector<16xf32> to vector<16x1xf32>
    %cst_5 = arith.constant 3.200000e+01 : f32
    %5 = vector.broadcast %cst_5 : f32 to vector<16x1xf32>
    %6 = arith.divf %4, %5 : vector<16x1xf32>
    %7 = vector.broadcast %6 : vector<16x1xf32> to vector<16x32xf32>
    %8 = arith.subf %0, %7 : vector<16x32xf32>
    %9 = arith.mulf %8, %8 : vector<16x32xf32>
    %cst_6 = arith.constant dense<0.000000e+00> : vector<16xf32>
    %10 = vector.multi_reduction <add>, %9, %cst_6 [1] : vector<16x32xf32> to vector<16xf32>
    %11 = vector.shape_cast %10 : vector<16xf32> to vector<16x1xf32>
    %cst_7 = arith.constant 3.200000e+01 : f32
    %12 = vector.broadcast %cst_7 : f32 to vector<16x1xf32>
    %13 = arith.divf %11, %12 : vector<16x1xf32>
    %14 = vector.broadcast %6 : vector<16x1xf32> to vector<16x32xf32>
    %15 = arith.subf %0, %14 : vector<16x32xf32>
    %cst_8 = arith.constant 9.99999996E-13 : f32
    %16 = vector.broadcast %cst_8 : f32 to vector<16x1xf32>
    %17 = arith.addf %13, %16 : vector<16x1xf32>
    %18 = math.rsqrt %17 : vector<16x1xf32>
    %19 = vector.broadcast %18 : vector<16x1xf32> to vector<16x32xf32>
    %20 = arith.mulf %15, %19 : vector<16x32xf32>
    %21 = vector.broadcast %1 : vector<1x32xf32> to vector<16x32xf32>
    %22 = arith.mulf %20, %21 : vector<16x32xf32>
    %23 = vector.broadcast %2 : vector<1x32xf32> to vector<16x32xf32>
    %24 = arith.addf %22, %23 : vector<16x32xf32>
    %c0_9 = arith.constant 0 : index
    %c0_10 = arith.constant 0 : index
    %25 = vector.load %arg3[%c0_9, %c0_10] : memref<16x32xf32, #tpu.memory_space<vmem>>, vector<16x32xf32>
    tpu.vector_store %arg3[%c0_9, %c0_10], %24 {strides = array<i32>} : memref<16x32xf32, #tpu.memory_space<vmem>>, vector<16x32xf32>,
    return
  }
}

module attributes {stable_mosaic.version = 11 : i64} {
  func.func @head_kernel(%arg0: memref<2x32xf32, #tpu.memory_space<vmem>>, %arg1: memref<32x32xf32, #tpu.memory_space<vmem>>, %arg2: memref<1x32xf32, #tpu.memory_space<vmem>>, %arg3: memref<32x1xf32, #tpu.memory_space<vmem>>, %arg4: memref<1x1xf32, #tpu.memory_space<vmem>>, %arg5: memref<2x1xf32, #tpu.memory_space<vmem>>) attributes {dimension_semantics = [], scalar_prefetch = 0 : i64, scratch_operands = 0 : i64, tpu.core_type = #tpu.core_type<tc>} {
    %c0 = arith.constant 0 : index
    %c0_0 = arith.constant 0 : index
    %0 = vector.load %arg0[%c0, %c0_0] : memref<2x32xf32, #tpu.memory_space<vmem>>, vector<2x32xf32>
    %c0_1 = arith.constant 0 : index
    %c0_2 = arith.constant 0 : index
    %1 = vector.load %arg1[%c0_1, %c0_2] : memref<32x32xf32, #tpu.memory_space<vmem>>, vector<32x32xf32>
    %cst = arith.constant dense<0.000000e+00> : vector<2x32xf32>
    %2 = tpu.matmul %0, %1, %cst {dimension_numbers = #tpu.dot_dimension_numbers<[1], [0], [0], [1], [0, 0, 1, 1], [], []>} : vector<2x32xf32>, vector<32x32xf32>, vector<2x32xf32> -> vector<2x32xf32>
    %c0_3 = arith.constant 0 : index
    %c0_4 = arith.constant 0 : index
    %3 = vector.load %arg2[%c0_3, %c0_4] : memref<1x32xf32, #tpu.memory_space<vmem>>, vector<1x32xf32>
    %4 = vector.broadcast %3 : vector<1x32xf32> to vector<2x32xf32>
    %5 = arith.addf %2, %4 : vector<2x32xf32>
    %6 = math.tanh %5 : vector<2x32xf32>
    %c0_5 = arith.constant 0 : index
    %c0_6 = arith.constant 0 : index
    %7 = vector.load %arg3[%c0_5, %c0_6] : memref<32x1xf32, #tpu.memory_space<vmem>>, vector<32x1xf32>
    %cst_7 = arith.constant dense<0.000000e+00> : vector<2x1xf32>
    %8 = tpu.matmul %6, %7, %cst_7 {dimension_numbers = #tpu.dot_dimension_numbers<[1], [0], [0], [1], [0, 0, 1, 1], [], []>} : vector<2x32xf32>, vector<32x1xf32>, vector<2x1xf32> -> vector<2x1xf32>
    %c0_8 = arith.constant 0 : index
    %c0_9 = arith.constant 0 : index
    %9 = vector.load %arg4[%c0_8, %c0_9] : memref<1x1xf32, #tpu.memory_space<vmem>>, vector<1x1xf32>
    %10 = vector.broadcast %9 : vector<1x1xf32> to vector<2x1xf32>
    %11 = arith.addf %8, %10 : vector<2x1xf32>
    %c0_10 = arith.constant 0 : index
    %c0_11 = arith.constant 0 : index
    %12 = vector.load %arg5[%c0_10, %c0_11] : memref<2x1xf32, #tpu.memory_space<vmem>>, vector<2x1xf32>
    tpu.vector_store %arg5[%c0_10, %c0_11], %11 {strides = array<i32>} : memref<2x1xf32, #tpu.memory_space<vmem>>, vector<2x1xf32>,
    return
  }
}

module attributes {stable_mosaic.version = 11 : i64} {
  func.func @encoder_layer_kernel(%arg0: memref<16x32xf32, #tpu.memory_space<vmem>>, %arg1: memref<2x8xf32, #tpu.memory_space<vmem>>, %arg2: memref<32x96xf32, #tpu.memory_space<vmem>>, %arg3: memref<1x96xf32, #tpu.memory_space<vmem>>, %arg4: memref<32x32xf32, #tpu.memory_space<vmem>>, %arg5: memref<1x32xf32, #tpu.memory_space<vmem>>, %arg6: memref<1x32xf32, #tpu.memory_space<vmem>>, %arg7: memref<1x32xf32, #tpu.memory_space<vmem>>, %arg8: memref<32x64xf32, #tpu.memory_space<vmem>>, %arg9: memref<1x64xf32, #tpu.memory_space<vmem>>, %arg10: memref<64x32xf32, #tpu.memory_space<vmem>>, %arg11: memref<1x32xf32, #tpu.memory_space<vmem>>, %arg12: memref<1x32xf32, #tpu.memory_space<vmem>>, %arg13: memref<1x32xf32, #tpu.memory_space<vmem>>, %arg14: memref<16x32xf32, #tpu.memory_space<vmem>>, %arg15: memref<16x32xf32, #tpu.memory_space<vmem>>) attributes {dimension_semantics = [], scalar_prefetch = 0 : i64, scratch_operands = 1 : i64, tpu.core_type = #tpu.core_type<tc>} {
    %c0 = arith.constant 0 : index
    %c0_0 = arith.constant 0 : index
    %0 = vector.load %arg0[%c0, %c0_0] : memref<16x32xf32, #tpu.memory_space<vmem>>, vector<16x32xf32>
    %c0_1 = arith.constant 0 : index
    %c0_2 = arith.constant 0 : index
    %1 = vector.load %arg2[%c0_1, %c0_2] : memref<32x96xf32, #tpu.memory_space<vmem>>, vector<32x96xf32>
    %cst = arith.constant dense<0.000000e+00> : vector<16x96xf32>
    %2 = tpu.matmul %0, %1, %cst {dimension_numbers = #tpu.dot_dimension_numbers<[1], [0], [0], [1], [0, 0, 1, 1], [], []>} : vector<16x32xf32>, vector<32x96xf32>, vector<16x96xf32> -> vector<16x96xf32>
    %c0_3 = arith.constant 0 : index
    %c0_4 = arith.constant 0 : index
    %3 = vector.load %arg3[%c0_3, %c0_4] : memref<1x96xf32, #tpu.memory_space<vmem>>, vector<1x96xf32>
    %4 = vector.broadcast %3 : vector<1x96xf32> to vector<16x96xf32>
    %5 = arith.addf %2, %4 : vector<16x96xf32>
    %cst_5 = arith.constant 8.000000e+00 : f32
    %6 = math.sqrt %cst_5 : f32
    %cst_6 = arith.constant 1.000000e+00 : f32
    %7 = arith.divf %cst_6, %6 : f32
    %c0_7 = arith.constant 0 : index
    %c0_8 = arith.constant 0 : index
    %8 = vector.load %arg1[%c0_7, %c0_8] : memref<2x8xf32, #tpu.memory_space<vmem>>, vector<1x8xf32>
    %9 = vector.extract_strided_slice %5 {offsets = [0, 0], sizes = [8, 8], strides = [1, 1]} : vector<16x96xf32> to vector<8x8xf32>
    %10 = vector.extract_strided_slice %5 {offsets = [0, 32], sizes = [8, 8], strides = [1, 1]} : vector<16x96xf32> to vector<8x8xf32>
    %11 = vector.extract_strided_slice %5 {offsets = [0, 64], sizes = [8, 8], strides = [1, 1]} : vector<16x96xf32> to vector<8x8xf32>
    %12 = tpu.transpose %10, [1, 0] : vector<8x8xf32> -> vector<8x8xf32>
    %cst_9 = arith.constant dense<0.000000e+00> : vector<8x8xf32>
    %13 = tpu.matmul %9, %12, %cst_9 {dimension_numbers = #tpu.dot_dimension_numbers<[1], [0], [0], [1], [0, 0, 1, 1], [], []>} : vector<8x8xf32>, vector<8x8xf32>, vector<8x8xf32> -> vector<8x8xf32>
    %14 = vector.broadcast %7 : f32 to vector<8x8xf32>
    %15 = arith.mulf %13, %14 : vector<8x8xf32>
    %16 = vector.broadcast %8 : vector<1x8xf32> to vector<8x8xf32>
    %17 = arith.addf %15, %16 : vector<8x8xf32>
    %cst_10 = arith.constant dense<0xFF800000> : vector<8xf32>
    %18 = vector.multi_reduction <maximumf>, %17, %cst_10 [1] : vector<8x8xf32> to vector<8xf32>
    %19 = vector.shape_cast %18 : vector<8xf32> to vector<8x1xf32>
    %20 = vector.broadcast %19 : vector<8x1xf32> to vector<8x8xf32>
    %21 = arith.subf %17, %20 : vector<8x8xf32>
    %22 = math.exp %21 : vector<8x8xf32>
    %cst_11 = arith.constant dense<0.000000e+00> : vector<8xf32>
    %23 = vector.multi_reduction <add>, %22, %cst_11 [1] : vector<8x8xf32> to vector<8xf32>
    %24 = vector.shape_cast %23 : vector<8xf32> to vector<8x1xf32>
    %25 = vector.broadcast %24 : vector<8x1xf32> to vector<8x8xf32>
    %26 = arith.divf %22, %25 : vector<8x8xf32>
    %cst_12 = arith.constant dense<0.000000e+00> : vector<8x8xf32>
    %27 = tpu.matmul %26, %11, %cst_12 {dimension_numbers = #tpu.dot_dimension_numbers<[1], [0], [0], [1], [0, 0, 1, 1], [], []>} : vector<8x8xf32>, vector<8x8xf32>, vector<8x8xf32> -> vector<8x8xf32>
    %c0_13 = arith.constant 0 : index
    %c0_14 = arith.constant 0 : index
    %28 = vector.load %arg15[%c0_13, %c0_14] : memref<16x32xf32, #tpu.memory_space<vmem>>, vector<8x8xf32>
    tpu.vector_store %arg15[%c0_13, %c0_14], %27 {strides = array<i32>} : memref<16x32xf32, #tpu.memory_space<vmem>>, vector<8x8xf32>,
    %29 = vector.extract_strided_slice %5 {offsets = [0, 8], sizes = [8, 8], strides = [1, 1]} : vector<16x96xf32> to vector<8x8xf32>
    %30 = vector.extract_strided_slice %5 {offsets = [0, 40], sizes = [8, 8], strides = [1, 1]} : vector<16x96xf32> to vector<8x8xf32>
    %31 = vector.extract_strided_slice %5 {offsets = [0, 72], sizes = [8, 8], strides = [1, 1]} : vector<16x96xf32> to vector<8x8xf32>
    %32 = tpu.transpose %30, [1, 0] : vector<8x8xf32> -> vector<8x8xf32>
    %cst_15 = arith.constant dense<0.000000e+00> : vector<8x8xf32>
    %33 = tpu.matmul %29, %32, %cst_15 {dimension_numbers = #tpu.dot_dimension_numbers<[1], [0], [0], [1], [0, 0, 1, 1], [], []>} : vector<8x8xf32>, vector<8x8xf32>, vector<8x8xf32> -> vector<8x8xf32>
    %34 = vector.broadcast %7 : f32 to vector<8x8xf32>
    %35 = arith.mulf %33, %34 : vector<8x8xf32>
    %36 = vector.broadcast %8 : vector<1x8xf32> to vector<8x8xf32>
    %37 = arith.addf %35, %36 : vector<8x8xf32>
    %cst_16 = arith.constant dense<0xFF800000> : vector<8xf32>
    %38 = vector.multi_reduction <maximumf>, %37, %cst_16 [1] : vector<8x8xf32> to vector<8xf32>
    %39 = vector.shape_cast %38 : vector<8xf32> to vector<8x1xf32>
    %40 = vector.broadcast %39 : vector<8x1xf32> to vector<8x8xf32>
    %41 = arith.subf %37, %40 : vector<8x8xf32>
    %42 = math.exp %41 : vector<8x8xf32>
    %cst_17 = arith.constant dense<0.000000e+00> : vector<8xf32>
    %43 = vector.multi_reduction <add>, %42, %cst_17 [1] : vector<8x8xf32> to vector<8xf32>
    %44 = vector.shape_cast %43 : vector<8xf32> to vector<8x1xf32>
    %45 = vector.broadcast %44 : vector<8x1xf32> to vector<8x8xf32>
    %46 = arith.divf %42, %45 : vector<8x8xf32>
    %cst_18 = arith.constant dense<0.000000e+00> : vector<8x8xf32>
    %47 = tpu.matmul %46, %31, %cst_18 {dimension_numbers = #tpu.dot_dimension_numbers<[1], [0], [0], [1], [0, 0, 1, 1], [], []>} : vector<8x8xf32>, vector<8x8xf32>, vector<8x8xf32> -> vector<8x8xf32>
    %c0_19 = arith.constant 0 : index
    %c8 = arith.constant 8 : index
    %48 = vector.load %arg15[%c0_19, %c8] : memref<16x32xf32, #tpu.memory_space<vmem>>, vector<8x8xf32>
    tpu.vector_store %arg15[%c0_19, %c8], %47 {strides = array<i32>} : memref<16x32xf32, #tpu.memory_space<vmem>>, vector<8x8xf32>,
    %49 = vector.extract_strided_slice %5 {offsets = [0, 16], sizes = [8, 8], strides = [1, 1]} : vector<16x96xf32> to vector<8x8xf32>
    %50 = vector.extract_strided_slice %5 {offsets = [0, 48], sizes = [8, 8], strides = [1, 1]} : vector<16x96xf32> to vector<8x8xf32>
    %51 = vector.extract_strided_slice %5 {offsets = [0, 80], sizes = [8, 8], strides = [1, 1]} : vector<16x96xf32> to vector<8x8xf32>
    %52 = tpu.transpose %50, [1, 0] : vector<8x8xf32> -> vector<8x8xf32>
    %cst_20 = arith.constant dense<0.000000e+00> : vector<8x8xf32>
    %53 = tpu.matmul %49, %52, %cst_20 {dimension_numbers = #tpu.dot_dimension_numbers<[1], [0], [0], [1], [0, 0, 1, 1], [], []>} : vector<8x8xf32>, vector<8x8xf32>, vector<8x8xf32> -> vector<8x8xf32>
    %54 = vector.broadcast %7 : f32 to vector<8x8xf32>
    %55 = arith.mulf %53, %54 : vector<8x8xf32>
    %56 = vector.broadcast %8 : vector<1x8xf32> to vector<8x8xf32>
    %57 = arith.addf %55, %56 : vector<8x8xf32>
    %cst_21 = arith.constant dense<0xFF800000> : vector<8xf32>
    %58 = vector.multi_reduction <maximumf>, %57, %cst_21 [1] : vector<8x8xf32> to vector<8xf32>
    %59 = vector.shape_cast %58 : vector<8xf32> to vector<8x1xf32>
    %60 = vector.broadcast %59 : vector<8x1xf32> to vector<8x8xf32>
    %61 = arith.subf %57, %60 : vector<8x8xf32>
    %62 = math.exp %61 : vector<8x8xf32>
    %cst_22 = arith.constant dense<0.000000e+00> : vector<8xf32>
    %63 = vector.multi_reduction <add>, %62, %cst_22 [1] : vector<8x8xf32> to vector<8xf32>
    %64 = vector.shape_cast %63 : vector<8xf32> to vector<8x1xf32>
    %65 = vector.broadcast %64 : vector<8x1xf32> to vector<8x8xf32>
    %66 = arith.divf %62, %65 : vector<8x8xf32>
    %cst_23 = arith.constant dense<0.000000e+00> : vector<8x8xf32>
    %67 = tpu.matmul %66, %51, %cst_23 {dimension_numbers = #tpu.dot_dimension_numbers<[1], [0], [0], [1], [0, 0, 1, 1], [], []>} : vector<8x8xf32>, vector<8x8xf32>, vector<8x8xf32> -> vector<8x8xf32>
    %c0_24 = arith.constant 0 : index
    %c16 = arith.constant 16 : index
    %68 = vector.load %arg15[%c0_24, %c16] : memref<16x32xf32, #tpu.memory_space<vmem>>, vector<8x8xf32>
    tpu.vector_store %arg15[%c0_24, %c16], %67 {strides = array<i32>} : memref<16x32xf32, #tpu.memory_space<vmem>>, vector<8x8xf32>,
    %69 = vector.extract_strided_slice %5 {offsets = [0, 24], sizes = [8, 8], strides = [1, 1]} : vector<16x96xf32> to vector<8x8xf32>
    %70 = vector.extract_strided_slice %5 {offsets = [0, 56], sizes = [8, 8], strides = [1, 1]} : vector<16x96xf32> to vector<8x8xf32>
    %71 = vector.extract_strided_slice %5 {offsets = [0, 88], sizes = [8, 8], strides = [1, 1]} : vector<16x96xf32> to vector<8x8xf32>
    %72 = tpu.transpose %70, [1, 0] : vector<8x8xf32> -> vector<8x8xf32>
    %cst_25 = arith.constant dense<0.000000e+00> : vector<8x8xf32>
    %73 = tpu.matmul %69, %72, %cst_25 {dimension_numbers = #tpu.dot_dimension_numbers<[1], [0], [0], [1], [0, 0, 1, 1], [], []>} : vector<8x8xf32>, vector<8x8xf32>, vector<8x8xf32> -> vector<8x8xf32>
    %74 = vector.broadcast %7 : f32 to vector<8x8xf32>
    %75 = arith.mulf %73, %74 : vector<8x8xf32>
    %76 = vector.broadcast %8 : vector<1x8xf32> to vector<8x8xf32>
    %77 = arith.addf %75, %76 : vector<8x8xf32>
    %cst_26 = arith.constant dense<0xFF800000> : vector<8xf32>
    %78 = vector.multi_reduction <maximumf>, %77, %cst_26 [1] : vector<8x8xf32> to vector<8xf32>
    %79 = vector.shape_cast %78 : vector<8xf32> to vector<8x1xf32>
    %80 = vector.broadcast %79 : vector<8x1xf32> to vector<8x8xf32>
    %81 = arith.subf %77, %80 : vector<8x8xf32>
    %82 = math.exp %81 : vector<8x8xf32>
    %cst_27 = arith.constant dense<0.000000e+00> : vector<8xf32>
    %83 = vector.multi_reduction <add>, %82, %cst_27 [1] : vector<8x8xf32> to vector<8xf32>
    %84 = vector.shape_cast %83 : vector<8xf32> to vector<8x1xf32>
    %85 = vector.broadcast %84 : vector<8x1xf32> to vector<8x8xf32>
    %86 = arith.divf %82, %85 : vector<8x8xf32>
    %cst_28 = arith.constant dense<0.000000e+00> : vector<8x8xf32>
    %87 = tpu.matmul %86, %71, %cst_28 {dimension_numbers = #tpu.dot_dimension_numbers<[1], [0], [0], [1], [0, 0, 1, 1], [], []>} : vector<8x8xf32>, vector<8x8xf32>, vector<8x8xf32> -> vector<8x8xf32>
    %c0_29 = arith.constant 0 : index
    %c24 = arith.constant 24 : index
    %88 = vector.load %arg15[%c0_29, %c24] : memref<16x32xf32, #tpu.memory_space<vmem>>, vector<8x8xf32>
    tpu.vector_store %arg15[%c0_29, %c24], %87 {strides = array<i32>} : memref<16x32xf32, #tpu.memory_space<vmem>>, vector<8x8xf32>,
    %c1 = arith.constant 1 : index
    %c0_30 = arith.constant 0 : index
    %89 = vector.load %arg1[%c1, %c0_30] : memref<2x8xf32, #tpu.memory_space<vmem>>, vector<1x8xf32>
    %90 = vector.extract_strided_slice %5 {offsets = [8, 0], sizes = [8, 8], strides = [1, 1]} : vector<16x96xf32> to vector<8x8xf32>
    %91 = vector.extract_strided_slice %5 {offsets = [8, 32], sizes = [8, 8], strides = [1, 1]} : vector<16x96xf32> to vector<8x8xf32>
    %92 = vector.extract_strided_slice %5 {offsets = [8, 64], sizes = [8, 8], strides = [1, 1]} : vector<16x96xf32> to vector<8x8xf32>
    %93 = tpu.transpose %91, [1, 0] : vector<8x8xf32> -> vector<8x8xf32>
    %cst_31 = arith.constant dense<0.000000e+00> : vector<8x8xf32>
    %94 = tpu.matmul %90, %93, %cst_31 {dimension_numbers = #tpu.dot_dimension_numbers<[1], [0], [0], [1], [0, 0, 1, 1], [], []>} : vector<8x8xf32>, vector<8x8xf32>, vector<8x8xf32> -> vector<8x8xf32>
    %95 = vector.broadcast %7 : f32 to vector<8x8xf32>
    %96 = arith.mulf %94, %95 : vector<8x8xf32>
    %97 = vector.broadcast %89 : vector<1x8xf32> to vector<8x8xf32>
    %98 = arith.addf %96, %97 : vector<8x8xf32>
    %cst_32 = arith.constant dense<0xFF800000> : vector<8xf32>
    %99 = vector.multi_reduction <maximumf>, %98, %cst_32 [1] : vector<8x8xf32> to vector<8xf32>
    %100 = vector.shape_cast %99 : vector<8xf32> to vector<8x1xf32>
    %101 = vector.broadcast %100 : vector<8x1xf32> to vector<8x8xf32>
    %102 = arith.subf %98, %101 : vector<8x8xf32>
    %103 = math.exp %102 : vector<8x8xf32>
    %cst_33 = arith.constant dense<0.000000e+00> : vector<8xf32>
    %104 = vector.multi_reduction <add>, %103, %cst_33 [1] : vector<8x8xf32> to vector<8xf32>
    %105 = vector.shape_cast %104 : vector<8xf32> to vector<8x1xf32>
    %106 = vector.broadcast %105 : vector<8x1xf32> to vector<8x8xf32>
    %107 = arith.divf %103, %106 : vector<8x8xf32>
    %cst_34 = arith.constant dense<0.000000e+00> : vector<8x8xf32>
    %108 = tpu.matmul %107, %92, %cst_34 {dimension_numbers = #tpu.dot_dimension_numbers<[1], [0], [0], [1], [0, 0, 1, 1], [], []>} : vector<8x8xf32>, vector<8x8xf32>, vector<8x8xf32> -> vector<8x8xf32>
    %c8_35 = arith.constant 8 : index
    %c0_36 = arith.constant 0 : index
    %109 = vector.load %arg15[%c8_35, %c0_36] : memref<16x32xf32, #tpu.memory_space<vmem>>, vector<8x8xf32>
    tpu.vector_store %arg15[%c8_35, %c0_36], %108 {strides = array<i32>} : memref<16x32xf32, #tpu.memory_space<vmem>>, vector<8x8xf32>,
    %110 = vector.extract_strided_slice %5 {offsets = [8, 8], sizes = [8, 8], strides = [1, 1]} : vector<16x96xf32> to vector<8x8xf32>
    %111 = vector.extract_strided_slice %5 {offsets = [8, 40], sizes = [8, 8], strides = [1, 1]} : vector<16x96xf32> to vector<8x8xf32>
    %112 = vector.extract_strided_slice %5 {offsets = [8, 72], sizes = [8, 8], strides = [1, 1]} : vector<16x96xf32> to vector<8x8xf32>
    %113 = tpu.transpose %111, [1, 0] : vector<8x8xf32> -> vector<8x8xf32>
    %cst_37 = arith.constant dense<0.000000e+00> : vector<8x8xf32>
    %114 = tpu.matmul %110, %113, %cst_37 {dimension_numbers = #tpu.dot_dimension_numbers<[1], [0], [0], [1], [0, 0, 1, 1], [], []>} : vector<8x8xf32>, vector<8x8xf32>, vector<8x8xf32> -> vector<8x8xf32>
    %115 = vector.broadcast %7 : f32 to vector<8x8xf32>
    %116 = arith.mulf %114, %115 : vector<8x8xf32>
    %117 = vector.broadcast %89 : vector<1x8xf32> to vector<8x8xf32>
    %118 = arith.addf %116, %117 : vector<8x8xf32>
    %cst_38 = arith.constant dense<0xFF800000> : vector<8xf32>
    %119 = vector.multi_reduction <maximumf>, %118, %cst_38 [1] : vector<8x8xf32> to vector<8xf32>
    %120 = vector.shape_cast %119 : vector<8xf32> to vector<8x1xf32>
    %121 = vector.broadcast %120 : vector<8x1xf32> to vector<8x8xf32>
    %122 = arith.subf %118, %121 : vector<8x8xf32>
    %123 = math.exp %122 : vector<8x8xf32>
    %cst_39 = arith.constant dense<0.000000e+00> : vector<8xf32>
    %124 = vector.multi_reduction <add>, %123, %cst_39 [1] : vector<8x8xf32> to vector<8xf32>
    %125 = vector.shape_cast %124 : vector<8xf32> to vector<8x1xf32>
    %126 = vector.broadcast %125 : vector<8x1xf32> to vector<8x8xf32>
    %127 = arith.divf %123, %126 : vector<8x8xf32>
    %cst_40 = arith.constant dense<0.000000e+00> : vector<8x8xf32>
    %128 = tpu.matmul %127, %112, %cst_40 {dimension_numbers = #tpu.dot_dimension_numbers<[1], [0], [0], [1], [0, 0, 1, 1], [], []>} : vector<8x8xf32>, vector<8x8xf32>, vector<8x8xf32> -> vector<8x8xf32>
    %c8_41 = arith.constant 8 : index
    %c8_42 = arith.constant 8 : index
    %129 = vector.load %arg15[%c8_41, %c8_42] : memref<16x32xf32, #tpu.memory_space<vmem>>, vector<8x8xf32>
    tpu.vector_store %arg15[%c8_41, %c8_42], %128 {strides = array<i32>} : memref<16x32xf32, #tpu.memory_space<vmem>>, vector<8x8xf32>,
    %130 = vector.extract_strided_slice %5 {offsets = [8, 16], sizes = [8, 8], strides = [1, 1]} : vector<16x96xf32> to vector<8x8xf32>
    %131 = vector.extract_strided_slice %5 {offsets = [8, 48], sizes = [8, 8], strides = [1, 1]} : vector<16x96xf32> to vector<8x8xf32>
    %132 = vector.extract_strided_slice %5 {offsets = [8, 80], sizes = [8, 8], strides = [1, 1]} : vector<16x96xf32> to vector<8x8xf32>
    %133 = tpu.transpose %131, [1, 0] : vector<8x8xf32> -> vector<8x8xf32>
    %cst_43 = arith.constant dense<0.000000e+00> : vector<8x8xf32>
    %134 = tpu.matmul %130, %133, %cst_43 {dimension_numbers = #tpu.dot_dimension_numbers<[1], [0], [0], [1], [0, 0, 1, 1], [], []>} : vector<8x8xf32>, vector<8x8xf32>, vector<8x8xf32> -> vector<8x8xf32>
    %135 = vector.broadcast %7 : f32 to vector<8x8xf32>
    %136 = arith.mulf %134, %135 : vector<8x8xf32>
    %137 = vector.broadcast %89 : vector<1x8xf32> to vector<8x8xf32>
    %138 = arith.addf %136, %137 : vector<8x8xf32>
    %cst_44 = arith.constant dense<0xFF800000> : vector<8xf32>
    %139 = vector.multi_reduction <maximumf>, %138, %cst_44 [1] : vector<8x8xf32> to vector<8xf32>
    %140 = vector.shape_cast %139 : vector<8xf32> to vector<8x1xf32>
    %141 = vector.broadcast %140 : vector<8x1xf32> to vector<8x8xf32>
    %142 = arith.subf %138, %141 : vector<8x8xf32>
    %143 = math.exp %142 : vector<8x8xf32>
    %cst_45 = arith.constant dense<0.000000e+00> : vector<8xf32>
    %144 = vector.multi_reduction <add>, %143, %cst_45 [1] : vector<8x8xf32> to vector<8xf32>
    %145 = vector.shape_cast %144 : vector<8xf32> to vector<8x1xf32>
    %146 = vector.broadcast %145 : vector<8x1xf32> to vector<8x8xf32>
    %147 = arith.divf %143, %146 : vector<8x8xf32>
    %cst_46 = arith.constant dense<0.000000e+00> : vector<8x8xf32>
    %148 = tpu.matmul %147, %132, %cst_46 {dimension_numbers = #tpu.dot_dimension_numbers<[1], [0], [0], [1], [0, 0, 1, 1], [], []>} : vector<8x8xf32>, vector<8x8xf32>, vector<8x8xf32> -> vector<8x8xf32>
    %c8_47 = arith.constant 8 : index
    %c16_48 = arith.constant 16 : index
    %149 = vector.load %arg15[%c8_47, %c16_48] : memref<16x32xf32, #tpu.memory_space<vmem>>, vector<8x8xf32>
    tpu.vector_store %arg15[%c8_47, %c16_48], %148 {strides = array<i32>} : memref<16x32xf32, #tpu.memory_space<vmem>>, vector<8x8xf32>,
    %150 = vector.extract_strided_slice %5 {offsets = [8, 24], sizes = [8, 8], strides = [1, 1]} : vector<16x96xf32> to vector<8x8xf32>
    %151 = vector.extract_strided_slice %5 {offsets = [8, 56], sizes = [8, 8], strides = [1, 1]} : vector<16x96xf32> to vector<8x8xf32>
    %152 = vector.extract_strided_slice %5 {offsets = [8, 88], sizes = [8, 8], strides = [1, 1]} : vector<16x96xf32> to vector<8x8xf32>
    %153 = tpu.transpose %151, [1, 0] : vector<8x8xf32> -> vector<8x8xf32>
    %cst_49 = arith.constant dense<0.000000e+00> : vector<8x8xf32>
    %154 = tpu.matmul %150, %153, %cst_49 {dimension_numbers = #tpu.dot_dimension_numbers<[1], [0], [0], [1], [0, 0, 1, 1], [], []>} : vector<8x8xf32>, vector<8x8xf32>, vector<8x8xf32> -> vector<8x8xf32>
    %155 = vector.broadcast %7 : f32 to vector<8x8xf32>
    %156 = arith.mulf %154, %155 : vector<8x8xf32>
    %157 = vector.broadcast %89 : vector<1x8xf32> to vector<8x8xf32>
    %158 = arith.addf %156, %157 : vector<8x8xf32>
    %cst_50 = arith.constant dense<0xFF800000> : vector<8xf32>
    %159 = vector.multi_reduction <maximumf>, %158, %cst_50 [1] : vector<8x8xf32> to vector<8xf32>
    %160 = vector.shape_cast %159 : vector<8xf32> to vector<8x1xf32>
    %161 = vector.broadcast %160 : vector<8x1xf32> to vector<8x8xf32>
    %162 = arith.subf %158, %161 : vector<8x8xf32>
    %163 = math.exp %162 : vector<8x8xf32>
    %cst_51 = arith.constant dense<0.000000e+00> : vector<8xf32>
    %164 = vector.multi_reduction <add>, %163, %cst_51 [1] : vector<8x8xf32> to vector<8xf32>
    %165 = vector.shape_cast %164 : vector<8xf32> to vector<8x1xf32>
    %166 = vector.broadcast %165 : vector<8x1xf32> to vector<8x8xf32>
    %167 = arith.divf %163, %166 : vector<8x8xf32>
    %cst_52 = arith.constant dense<0.000000e+00> : vector<8x8xf32>
    %168 = tpu.matmul %167, %152, %cst_52 {dimension_numbers = #tpu.dot_dimension_numbers<[1], [0], [0], [1], [0, 0, 1, 1], [], []>} : vector<8x8xf32>, vector<8x8xf32>, vector<8x8xf32> -> vector<8x8xf32>
    %c8_53 = arith.constant 8 : index
    %c24_54 = arith.constant 24 : index
    %169 = vector.load %arg15[%c8_53, %c24_54] : memref<16x32xf32, #tpu.memory_space<vmem>>, vector<8x8xf32>
    tpu.vector_store %arg15[%c8_53, %c24_54], %168 {strides = array<i32>} : memref<16x32xf32, #tpu.memory_space<vmem>>, vector<8x8xf32>,
    %c0_55 = arith.constant 0 : index
    %c0_56 = arith.constant 0 : index
    %170 = vector.load %arg15[%c0_55, %c0_56] : memref<16x32xf32, #tpu.memory_space<vmem>>, vector<16x32xf32>
    %c0_57 = arith.constant 0 : index
    %c0_58 = arith.constant 0 : index
    %171 = vector.load %arg4[%c0_57, %c0_58] : memref<32x32xf32, #tpu.memory_space<vmem>>, vector<32x32xf32>
    %cst_59 = arith.constant dense<0.000000e+00> : vector<16x32xf32>
    %172 = tpu.matmul %170, %171, %cst_59 {dimension_numbers = #tpu.dot_dimension_numbers<[1], [0], [0], [1], [0, 0, 1, 1], [], []>} : vector<16x32xf32>, vector<32x32xf32>, vector<16x32xf32> -> vector<16x32xf32>
    %c0_60 = arith.constant 0 : index
    %c0_61 = arith.constant 0 : index
    %173 = vector.load %arg5[%c0_60, %c0_61] : memref<1x32xf32, #tpu.memory_space<vmem>>, vector<1x32xf32>
    %174 = vector.broadcast %173 : vector<1x32xf32> to vector<16x32xf32>
    %175 = arith.addf %172, %174 : vector<16x32xf32>
    %176 = arith.addf %175, %0 : vector<16x32xf32>
    %c0_62 = arith.constant 0 : index
    %c0_63 = arith.constant 0 : index
    %177 = vector.load %arg6[%c0_62, %c0_63] : memref<1x32xf32, #tpu.memory_space<vmem>>, vector<1x32xf32>
    %c0_64 = arith.constant 0 : index
    %c0_65 = arith.constant 0 : index
    %178 = vector.load %arg7[%c0_64, %c0_65] : memref<1x32xf32, #tpu.memory_space<vmem>>, vector<1x32xf32>
    %cst_66 = arith.constant dense<0.000000e+00> : vector<16xf32>
    %179 = vector.multi_reduction <add>, %176, %cst_66 [1] : vector<16x32xf32> to vector<16xf32>
    %180 = vector.shape_cast %179 : vector<16xf32> to vector<16x1xf32>
    %cst_67 = arith.constant 3.200000e+01 : f32
    %181 = vector.broadcast %cst_67 : f32 to vector<16x1xf32>
    %182 = arith.divf %180, %181 : vector<16x1xf32>
    %183 = vector.broadcast %182 : vector<16x1xf32> to vector<16x32xf32>
    %184 = arith.subf %176, %183 : vector<16x32xf32>
    %185 = arith.mulf %184, %184 : vector<16x32xf32>
    %cst_68 = arith.constant dense<0.000000e+00> : vector<16xf32>
    %186 = vector.multi_reduction <add>, %185, %cst_68 [1] : vector<16x32xf32> to vector<16xf32>
    %187 = vector.shape_cast %186 : vector<16xf32> to vector<16x1xf32>
    %cst_69 = arith.constant 3.200000e+01 : f32
    %188 = vector.broadcast %cst_69 : f32 to vector<16x1xf32>
    %189 = arith.divf %187, %188 : vector<16x1xf32>
    %190 = vector.broadcast %182 : vector<16x1xf32> to vector<16x32xf32>
    %191 = arith.subf %176, %190 : vector<16x32xf32>
    %cst_70 = arith.constant 9.99999996E-13 : f32
    %192 = vector.broadcast %cst_70 : f32 to vector<16x1xf32>
    %193 = arith.addf %189, %192 : vector<16x1xf32>
    %194 = math.rsqrt %193 : vector<16x1xf32>
    %195 = vector.broadcast %194 : vector<16x1xf32> to vector<16x32xf32>
    %196 = arith.mulf %191, %195 : vector<16x32xf32>
    %197 = vector.broadcast %177 : vector<1x32xf32> to vector<16x32xf32>
    %198 = arith.mulf %196, %197 : vector<16x32xf32>
    %199 = vector.broadcast %178 : vector<1x32xf32> to vector<16x32xf32>
    %200 = arith.addf %198, %199 : vector<16x32xf32>
    %c0_71 = arith.constant 0 : index
    %c0_72 = arith.constant 0 : index
    %201 = vector.load %arg8[%c0_71, %c0_72] : memref<32x64xf32, #tpu.memory_space<vmem>>, vector<32x64xf32>
    %cst_73 = arith.constant dense<0.000000e+00> : vector<16x64xf32>
    %202 = tpu.matmul %200, %201, %cst_73 {dimension_numbers = #tpu.dot_dimension_numbers<[1], [0], [0], [1], [0, 0, 1, 1], [], []>} : vector<16x32xf32>, vector<32x64xf32>, vector<16x64xf32> -> vector<16x64xf32>
    %c0_74 = arith.constant 0 : index
    %c0_75 = arith.constant 0 : index
    %203 = vector.load %arg9[%c0_74, %c0_75] : memref<1x64xf32, #tpu.memory_space<vmem>>, vector<1x64xf32>
    %204 = vector.broadcast %203 : vector<1x64xf32> to vector<16x64xf32>
    %205 = arith.addf %202, %204 : vector<16x64xf32>
    %cst_76 = arith.constant 0.636619746 : f32
    %206 = math.sqrt %cst_76 : f32
    %cst_77 = arith.constant 5.000000e-01 : f32
    %207 = vector.broadcast %cst_77 : f32 to vector<16x64xf32>
    %208 = arith.mulf %207, %205 : vector<16x64xf32>
    %cst_78 = arith.constant 4.471500e-02 : f32
    %209 = vector.broadcast %cst_78 : f32 to vector<16x64xf32>
    %210 = arith.mulf %209, %205 : vector<16x64xf32>
    %211 = arith.mulf %210, %205 : vector<16x64xf32>
    %212 = arith.mulf %211, %205 : vector<16x64xf32>
    %213 = arith.addf %205, %212 : vector<16x64xf32>
    %214 = vector.broadcast %206 : f32 to vector<16x64xf32>
    %215 = arith.mulf %214, %213 : vector<16x64xf32>
    %216 = math.tanh %215 : vector<16x64xf32>
    %cst_79 = arith.constant 1.000000e+00 : f32
    %217 = vector.broadcast %cst_79 : f32 to vector<16x64xf32>
    %218 = arith.addf %217, %216 : vector<16x64xf32>
    %219 = arith.mulf %208, %218 : vector<16x64xf32>
    %c0_80 = arith.constant 0 : index
    %c0_81 = arith.constant 0 : index
    %220 = vector.load %arg10[%c0_80, %c0_81] : memref<64x32xf32, #tpu.memory_space<vmem>>, vector<64x32xf32>
    %cst_82 = arith.constant dense<0.000000e+00> : vector<16x32xf32>
    %221 = tpu.matmul %219, %220, %cst_82 {dimension_numbers = #tpu.dot_dimension_numbers<[1], [0], [0], [1], [0, 0, 1, 1], [], []>} : vector<16x64xf32>, vector<64x32xf32>, vector<16x32xf32> -> vector<16x32xf32>
    %c0_83 = arith.constant 0 : index
    %c0_84 = arith.constant 0 : index
    %222 = vector.load %arg11[%c0_83, %c0_84] : memref<1x32xf32, #tpu.memory_space<vmem>>, vector<1x32xf32>
    %223 = vector.broadcast %222 : vector<1x32xf32> to vector<16x32xf32>
    %224 = arith.addf %221, %223 : vector<16x32xf32>
    %225 = arith.addf %224, %200 : vector<16x32xf32>
    %c0_85 = arith.constant 0 : index
    %c0_86 = arith.constant 0 : index
    %226 = vector.load %arg12[%c0_85, %c0_86] : memref<1x32xf32, #tpu.memory_space<vmem>>, vector<1x32xf32>
    %c0_87 = arith.constant 0 : index
    %c0_88 = arith.constant 0 : index
    %227 = vector.load %arg13[%c0_87, %c0_88] : memref<1x32xf32, #tpu.memory_space<vmem>>, vector<1x32xf32>
    %cst_89 = arith.constant dense<0.000000e+00> : vector<16xf32>
    %228 = vector.multi_reduction <add>, %225, %cst_89 [1] : vector<16x32xf32> to vector<16xf32>
    %229 = vector.shape_cast %228 : vector<16xf32> to vector<16x1xf32>
    %cst_90 = arith.constant 3.200000e+01 : f32
    %230 = vector.broadcast %cst_90 : f32 to vector<16x1xf32>
    %231 = arith.divf %229, %230 : vector<16x1xf32>
    %232 = vector.broadcast %231 : vector<16x1xf32> to vector<16x32xf32>
    %233 = arith.subf %225, %232 : vector<16x32xf32>
    %234 = arith.mulf %233, %233 : vector<16x32xf32>
    %cst_91 = arith.constant dense<0.000000e+00> : vector<16xf32>
    %235 = vector.multi_reduction <add>, %234, %cst_91 [1] : vector<16x32xf32> to vector<16xf32>
    %236 = vector.shape_cast %235 : vector<16xf32> to vector<16x1xf32>
    %cst_92 = arith.constant 3.200000e+01 : f32
    %237 = vector.broadcast %cst_92 : f32 to vector<16x1xf32>
    %238 = arith.divf %236, %237 : vector<16x1xf32>
    %239 = vector.broadcast %231 : vector<16x1xf32> to vector<16x32xf32>
    %240 = arith.subf %225, %239 : vector<16x32xf32>
    %cst_93 = arith.constant 9.99999996E-13 : f32
    %241 = vector.broadcast %cst_93 : f32 to vector<16x1xf32>
    %242 = arith.addf %238, %241 : vector<16x1xf32>
    %243 = math.rsqrt %242 : vector<16x1xf32>
    %244 = vector.broadcast %243 : vector<16x1xf32> to vector<16x32xf32>
    %245 = arith.mulf %240, %244 : vector<16x32xf32>
    %246 = vector.broadcast %226 : vector<1x32xf32> to vector<16x32xf32>
    %247 = arith.mulf %245, %246 : vector<16x32xf32>
    %248 = vector.broadcast %227 : vector<1x32xf32> to vector<16x32xf32>
    %249 = arith.addf %247, %248 : vector<16x32xf32>
    %c0_94 = arith.constant 0 : index
    %c0_95 = arith.constant 0 : index
    %250 = vector.load %arg14[%c0_94, %c0_95] : memref<16x32xf32, #tpu.memory_space<vmem>>, vector<16x32xf32>
    tpu.vector_store %arg14[%c0_94, %c0_95], %249 {strides = array<i32>} : memref<16x32xf32, #tpu.memory_space<vmem>>, vector<16x32xf32>,
    return
  }
}

</mosaic_0001>

<bundles_post_ra>
// kernel: bert_base_uncased_forward.4
= control target key start
LH: loop header
LB: loop body
LE: loop exit
PB: predicated region body
PF: predicated region fallthrough
CT: control target
= control target key end

     0   :  { %vm18_vm0 = vcmask 261120   ;;  %s118_s0 = inlined_call_operand.vmem [shape: f32[16,32], index: 0, kind: input, shape index: {}]   ;;  %s119_s1 = inlined_call_operand.vmem [shape: f32[1,32], index: 1, kind: input, shape index: {}]   ;;  %s120_s2 = inlined_call_operand.vmem [shape: f32[1,32], index: 2, kind: input, shape index: {}]   ;;  %s121_s3 = inlined_call_operand.vmem [shape: f32[16,32], index: 3, kind: output, shape index: {}]  }
   0x1   :  { %v14_v0 = vld [vmem:[%s118_s0] sm:$0xff]  ;;  %v15_v1 = vld [vmem:[%s118_s0 + $0x8] sm:$0xff] }
   0x2   :  { %v19_v2 = vsel %vm18_vm0, %v14_v0, 0.0  ;;  %v22_v3 = vsel %vm18_vm0, %v15_v1, 0.0  ;;  %v68_v21 = vld [vmem:[%s119_s1] ss:$0 sm:$0xff] }
   0x3   :  { %20 = vadd.xlane.f32.xlu0 %v19_v2  ;;  %v69_v23 = vld [vmem:[%s120_s2] ss:$0 sm:$0xff] }
   0x7   :  { %23 = vadd.xlane.f32.xlu0 %v22_v3 }
  0x90   :  { %v21_v4 = vpop.xlane.xlu0 %20 }
  0x91   :  { %v26_v5 = vmul.f32 0.03125, %v21_v4 }
  0x93   :  { %v28_v6 = vsub.f32 %v14_v0, %v26_v5 }
  0x94   :  { %v24_v7 = vpop.xlane.xlu0 %23 }
  0x95   :  { %v27_v8 = vmul.f32 0.03125, %v24_v7  ;;  %v30_v9 = vmul.f32 %v28_v6, %v28_v6 }
  0x97   :  { %v29_v10 = vsub.f32 %v15_v1, %v27_v8  ;;  %v32_v11 = vsel %vm18_vm0, %v30_v9, 0.0 }
  0x98   :  { %33 = vadd.xlane.f32.xlu1 %v32_v11 }
  0x99   :  { %v31_v12 = vmul.f32 %v29_v10, %v29_v10 }
  0x9b   :  { %v35_v13 = vsel %vm18_vm0, %v31_v12, 0.0 }
  0x9c   :  { %36 = vadd.xlane.f32.xlu1 %v35_v13 }
 0x125   :  { %v34_v14 = vpop.xlane.xlu1 %33 }
 0x126   :  { %v38_v15 = vmul.f32 0.03125, %v34_v14 }
 0x128   :  { %v40_v16 = vadd.f32 1e-12, %v38_v15 }
 0x129   :  { %v37_v17 = vpop.xlane.xlu1 %36 }
 0x12a   :  { %70 = vrsqrt.f32 %v40_v16  ;;  %v39_v18 = vmul.f32 0.03125, %v37_v17 }
 0x12c   :  { %v41_v19 = vadd.f32 1e-12, %v39_v18 }
 0x12e   :  { %72 = vrsqrt.f32 %v41_v19 }
 0x134   :  { %v71_v20 = vpop.eup %70 }
 0x135   :  { %v44_v22 = vmul.f32 %v71_v20, %v28_v6 }
 0x137   :  { %v52_v24 = vmul.f32 %v68_v21, %v44_v22 }
 0x138   :  { %v73_v25 = vpop.eup %72 }
 0x139   :  { %v60_v26 = vadd.f32 %v69_v23, %v52_v24  ;;  %v45_v27 = vmul.f32 %v73_v25, %v29_v10 }
 0x13b   :  { %62 = vst.msk [vmem:[%s121_s3] sm:$0xff] %vm18_vm0, %v60_v26  ;;  %v53_v28 = vmul.f32 %v68_v21, %v45_v27 }
 0x13d   :  { %v61_v29 = vadd.f32 %v69_v23, %v53_v28 }
 0x13f   :  { %63 = vst.msk [vmem:[%s121_s3 + $0x8] sm:$0xff] %vm18_vm0, %v61_v29 }

// kernel: bert_base_uncased_forward.7
= control target key start
LH: loop header
LB: loop body
LE: loop exit
PB: predicated region body
PF: predicated region fallthrough
CT: control target
= control target key end

     0   :  { %v252_v0 = vmov 0.0|0.0   ;;  %vm253_vm0 = vmmov 0   ;;  %v254_v4 = vmov 0.0   ;;  %vm34_vm1 = vcmask 261120   ;;  %s323_s1 = inlined_call_operand.vmem [shape: f32[32,32], index: 1, kind: input, shape index: {}]   ;;  %s324_s0 = inlined_call_operand.vmem [shape: f32[2,32], index: 0, kind: input, shape index: {}]   ;;  %s325_s3 = inlined_call_operand.vmem [shape: f32[32,1], index: 3, kind: input, shape index: {}]   ;;  %s326_s4 = inlined_call_operand.<no memory space> [shape: f32[1,1], index: 4, kind: input, shape index: {}]   ;;  %s327_s2 = inlined_call_operand.vmem [shape: f32[1,32], index: 2, kind: input, shape index: {}]   ;;  %s328_s5 = inlined_call_operand.vmem [shape: f32[2,1], index: 5, kind: output, shape index: {}]  }
   0x1   :  { %235 = vmatprep.subr.bf16.mxu0 %v252_v0  ;;  %v23_v1 = vld [vmem:[%s323_s1] sm:$0xff]  ;;  %v24_v2 = vld [vmem:[%s323_s1 + $0x8] sm:$0xff]  ;;  %v25_v3 = vld [vmem:[%s323_s1 + $0x10] sm:$0xff]  ;;  %221 = vmatprep.mubr.msk.f32.mxu0 %vm253_vm0, %v254_v4  ;;  %v10_v15 = vstv %s326_s4  ;;  %vm193_vm2 = vcmask 1024  }
   0x2   :  { %v236_v5 = vpack.c.bf16 %v24_v2, %v23_v1  ;;  %v26_v6 = vld [vmem:[%s323_s1 + $0x18] sm:$0xff]  ;;  %241 = vmatprep.subr.bf16.mxu1 %v252_v0  ;;  %232 = vmatprep.mubr.msk.f32.mxu1 %vm253_vm0, %v254_v4  ;;  %v22_v8 = vld [vmem:[%s324_s0] sm:$0x3]  ;;  %v110_v10 = vld [vmem:[%s325_s3 + $0x8] sm:$0xff]  ;;  %11 = vst [vmem:[#allocation2] sm:$0x1] %v10_v15 }
   0x3   :  { %v239_v7 = vpack.c.bf16 %v26_v6, %v25_v3  ;;  %v109_v9 = vld [vmem:[%s325_s3] sm:$0xff]  ;;  %v111_v11 = vld [vmem:[%s325_s3 + $0x10] sm:$0xff]  ;;  %v112_v13 = vld [vmem:[%s325_s3 + $0x18] sm:$0xff] }
   0x4   :  { %237 = vmatpush3.bf16.msra.mxu0 %v236_v5  ;;  %v242_v12 = vpack.c.bf16 %v110_v10, %v109_v9  ;;  %v245_v14 = vpack.c.bf16 %v112_v13, %v111_v11  ;;  %v199_v16 = vld [vmem:[%s327_s2] ss:$0 sm:$0xff] }
   0x5   :  { %238 = vmatprep.subr.bf16.mxu0 %v252_v0 }
   0x6   :  { %243 = vmatpush3.bf16.msra.mxu1 %v242_v12 }
   0x7   :  { %244 = vmatprep.subr.bf16.mxu1 %v252_v0 }
   0x8   :  { %240 = vmatpush3.bf16.msra.mxu0 %v239_v7 }
   0x9   :  { %v201_v21 = vld [vmem:[#allocation2] ss:$0 sm:$0xff] }
   0xa   :  { %246 = vmatpush3.bf16.msra.mxu1 %v245_v14 }
   0xb   :  { %222 = vmatmul.mubr.msk.f32.vlgmr.msra.gmra.mrb[0].mxu0 %vm34_vm1, %v22_v8 }
  0xde   :  { %v104_v17 = vpop.f32.mrb[0].mxu0 }
  0xdf   :  { %v105_v18 = vadd.f32 %v199_v16, %v104_v17  ;;  %v223_v19 = vpop.f32.mrb[1].mxu0 }
  0xe1   :  { %250 = vtanh.f32 %v105_v18 }
  0xeb   :  { %v251_v20 = vpop.eup %250 }
  0xec   :  { %233 = vmatmul.mubr.msk.f32.vlgmr.msra.gmra.mrb[0].mxu1 %vm34_vm1, %v251_v20 }
 0x1bf   :  { %v189_v22 = vpop.f32.mrb[0].mxu1 }
 0x1c0   :  { %v190_v23 = vadd.f32 %v201_v21, %v189_v22  ;;  %v234_v24 = vpop.f32.mrb[1].mxu1 }
 0x1c2   :  { %194 = vst.msk [vmem:[%s328_s5] sm:$0x3] %vm193_vm2, %v190_v23 }

// kernel: bert_base_uncased_forward.5
= control target key start
LH: loop header
LB: loop body
LE: loop exit
PB: predicated region body
PF: predicated region fallthrough
CT: control target
= control target key end

     0   :  { %vm60_vm0 = vcmask 261120   ;;  %v2256_v8 = vmov 0.0   ;;  %vm2257_vm1 = vmmov 0   ;;  %s2259_s26 = smov 96   ;;  %s2260_s27 = smov 80   ;;  %vm146_vm2 = vcmask 64512   ;;  %s2618_s2 = inlined_call_operand.vmem [shape: f32[32,96], index: 2, kind: input, shape index: {}]   ;;  %s2619_s0 = inlined_call_operand.vmem [shape: f32[16,32], index: 0, kind: input, shape index: {}]   ;;  %s2620_s3 = inlined_call_operand.vmem [shape: f32[1,96], index: 3, kind: input, shape index: {}]   ;;  %s2621_s1 = inlined_call_operand.vmem [shape: f32[2,8], index: 1, kind: input, shape index: {}]   ;;  %s2622_s4 = inlined_call_operand.vmem [shape: f32[32,32], index: 4, kind: input, shape index: {}]   ;;  %s2623_s5 = inlined_call_operand.vmem [shape: f32[1,32], index: 5, kind: input, shape index: {}]   ;;  %s2624_s8 = inlined_call_operand.vmem [shape: f32[32,64], index: 8, kind: input, shape index: {}]   ;;  %s2625_s6 = inlined_call_operand.vmem [shape: f32[1,32], index: 6, kind: input, shape index: {}]   ;;  %s2626_s7 = inlined_call_operand.vmem [shape: f32[1,32], index: 7, kind: input, shape index: {}]   ;;  %s2627_s10 = inlined_call_operand.vmem [shape: f32[64,32], index: 10, kind: input, shape index: {}]   ;;  %s2628_s9 = inlined_call_operand.vmem [shape: f32[1,64], index: 9, kind: input, shape index: {}]   ;;  %s2629_s11 = inlined_call_operand.vmem [shape: f32[1,32], index: 11, kind: input, shape index: {}]   ;;  %s2630_s12 = inlined_call_operand.vmem [shape: f32[1,32], index: 12, kind: input, shape index: {}]   ;;  %s2631_s13 = inlined_call_operand.vmem [shape: f32[1,32], index: 13, kind: input, shape index: {}]   ;;  %s2632_s14 = inlined_call_operand.vmem [shape: f32[16,32], index: 14, kind: output, shape index: {}]  }
   0x1   :  { %v49_v0 = vld [vmem:[%s2618_s2] sm:$0xff]  ;;  %v50_v1 = vld [vmem:[%s2618_s2 + $0x8] sm:$0xff]  ;;  %v51_v2 = vld [vmem:[%s2618_s2 + $0x10] sm:$0xff]  ;;  %2045 = vmatprep.subr.mxu0 %v2256_v8  ;;  %2047 = vmatprep.mubr.msk.f32.mxu0 %vm2257_vm1, %v2256_v8  ;;  %s2261_s28 = smov 88   ;;  %s2262_s29 = smov 72   ;;  %vm486_vm3 = vcmask 130112  }
   0x2   :  { %v2156_v3 = vpack.c.bf16 %v50_v1, %v49_v0  ;;  %v52_v4 = vld [vmem:[%s2618_s2 + $0x18] sm:$0xff]  ;;  %v2362_v5 = vld [vmem:[%s2619_s0] sm:$0xff]  ;;  %v2369_v7 = vld [vmem:[%s2619_s0 + $0x8] sm:$0xff]  ;;  %s2258_s0 = smov 120   ;;  %s2264_s30 = smov 104   ;;  %vm659_vm4 = vcmask 195712  }
   0x3   :  { %v2160_v6 = vpack.c.bf16 %v52_v4, %v51_v2  ;;  %2032 = vmatprep.mubr.msk.f32.mxu1 %vm60_vm0, %v2362_v5  ;;  %v1922_v9 = vld [vmem:[%s2620_s3] ss:$0 sm:$0xff]  ;;  %s2263_s3 = smov 112   ;;  %s2265_s15 = smov 56   ;;  %v1940_v50 = vld [vmem:[%s2621_s1 + $0x1] ss:$0 sm:$0xff] }
   0x4   :  { %2157 = vmatprep.subr.bf16.mxu1 %v2156_v3  ;;  %s2266_s16 = smov 64   ;;  %v1927_v30 = vld [vmem:[%s2621_s1] ss:$0 sm:$0xff]  ;;  %s2267_s1 = smov 40   ;;  %vm832_vm5 = vcmask 261312   ;;  %vm1788_vm6 = vcmask 523264  }
   0x5   :  { %2159 = vmatpush3.bf16.msra.mxu1 %v2156_v3  ;;  %s2268_s21 = smov 48   ;;  %s2269_s22 = smov 8  }
   0x6   :  { %2161 = vmatprep.subr.bf16.mxu1 %v2160_v6  ;;  %s2270_s23 = smov 16   ;;  %s2271_s24 = smov 24  }
   0x9   :  { %2163 = vmatpush3.bf16.msra.mxu1 %v2160_v6 }
   0xa   :  { %2035 = vmatprep.subr.mxu1 %v2256_v8 }
   0xc   :  { %2033 = vmatmul.mubr.msk.f32.vlgmr.msra.gmra.mrb[0].mxu1 %vm60_vm0, %v2369_v7 }
   0xd   :  { %2037 = vmatprep.mubr.msk.f32.mxu1 %vm2257_vm1, %v2256_v8 }
  0xdf   :  { %v2034_v10 = vpop.f32.mrb[0].mxu1 }
  0xe0   :  { %v133_v11 = vpop.f32.mrb[1].mxu1  ;;  %v2390_v13 = vadd.f32 %v2034_v10, %v1922_v9 }
  0xe1   :  { %v2382_v12 = vadd.f32 %v1922_v9, %v133_v11 }
  0xe3   :  { %315 = vrot.lane.b32.xlu1 %v2382_v12, %s2258_s0  ;;  %144 = vrot.lane.b32.xlu0 %v2382_v12, %s2259_s26 }
  0xe7   :  { %490 = vrot.lane.b32.xlu1 %v2382_v12, %s2260_s27  ;;  %317 = vrot.lane.b32.xlu0 %v2382_v12, %s2261_s28 }
  0xeb   :  { %663 = vrot.lane.b32.xlu1 %v2382_v12, %s2262_s29  ;;  %488 = vrot.lane.b32.xlu0 %v2382_v12, %s2263_s3 }
  0xef   :  { %836 = vrot.lane.b32.xlu1 %v2390_v13, %s2259_s26  ;;  %661 = vrot.lane.b32.xlu0 %v2382_v12, %s2264_s30 }
  0xf3   :  { %1006 = vrot.lane.b32.xlu1 %v2390_v13, %s2258_s0  ;;  %1008 = vrot.lane.b32.xlu0 %v2390_v13, %s2261_s28 }
  0xf7   :  { %1178 = vrot.lane.b32.xlu1 %v2390_v13, %s2263_s3  ;;  %1180 = vrot.lane.b32.xlu0 %v2390_v13, %s2260_s27 }
  0xfb   :  { %1350 = vrot.lane.b32.xlu1 %v2390_v13, %s2264_s30  ;;  %1352 = vrot.lane.b32.xlu0 %v2390_v13, %s2262_s29 }
  0xff   :  { %406 = vrot.lane.b32.xlu1 %v2382_v12, %s2265_s15  ;;  %238 = vrot.lane.b32.xlu0 %v2382_v12, %s2266_s16 }
 0x155   :  { %v316_v14 = vpop.permute.xlu1 %315  ;;  %v145_v15 = vpop.permute.xlu0 %144 }
 0x156   :  { %2036 = vmatpush3.xpose.msk.msra.mxu1 %vm146_vm2, %v145_v15 }
 0x157   :  { %2040 = vmatprep.subr.mxu1 %v2256_v8 }
 0x159   :  { %v491_v16 = vpop.permute.xlu1 %490  ;;  %2038 = vmatmul.mubr.msk.f32.vlgmr.msra.gmra.mrb[2].mxu1 %vm146_vm2, %v2382_v12  ;;  %v318_v17 = vpop.permute.xlu0 %317 }
 0x15a   :  { %2046 = vmatpush3.xpose.msk.msra.mxu0 %vm146_vm2, %v318_v17  ;;  %2042 = vmatprep.mubr.msk.f32.mxu1 %vm2257_vm1, %v2256_v8 }
 0x15b   :  { %2055 = vmatprep.subr.mxu0 %v2256_v8 }
 0x15d   :  { %v664_v18 = vpop.permute.xlu1 %663  ;;  %2048 = vmatmul.mubr.msk.f32.vlgmr.msra.gmra.mrb[0].mxu0 %vm146_vm2, %v316_v14  ;;  %v489_v19 = vpop.permute.xlu0 %488 }
 0x15e   :  { %2056 = vmatpush3.xpose.msk.msra.mxu0 %vm146_vm2, %v491_v16  ;;  %2057 = vmatprep.mubr.msk.f32.mxu0 %vm2257_vm1, %v2256_v8 }
 0x15f   :  { %2065 = vmatprep.subr.mxu0 %v2256_v8 }
 0x161   :  { %2058 = vmatmul.mubr.msk.f32.vlgmr.msra.gmra.mrb[2].mxu0 %vm146_vm2, %v489_v19  ;;  %v662_v20 = vpop.permute.xlu0 %661  ;;  %v837_v21 = vpop.permute.xlu1 %836 }
 0x162   :  { %2066 = vmatpush3.xpose.msk.msra.mxu0 %vm146_vm2, %v664_v18  ;;  %2067 = vmatprep.mubr.msk.f32.mxu0 %vm2257_vm1, %v2256_v8 }
 0x163   :  { %2075 = vmatprep.subr.mxu0 %v2256_v8 }
 0x165   :  { %2068 = vmatmul.mubr.msk.f32.vlgmr.msra.gmra.mrb[4].mxu0 %vm146_vm2, %v662_v20  ;;  %v1009_v22 = vpop.permute.xlu0 %1008  ;;  %v1007_v23 = vpop.permute.xlu1 %1006 }
 0x166   :  { %2076 = vmatpush3.xpose.msk.msra.mxu0 %vm146_vm2, %v837_v21  ;;  %2077 = vmatprep.mubr.msk.f32.mxu0 %vm2257_vm1, %v2256_v8 }
 0x167   :  { %2085 = vmatprep.subr.mxu0 %v2256_v8 }
 0x169   :  { %2078 = vmatmul.mubr.msk.f32.vlgmr.msra.gmra.mrb[6].mxu0 %vm146_vm2, %v2390_v13  ;;  %v1181_v24 = vpop.permute.xlu0 %1180  ;;  %v1179_v26 = vpop.permute.xlu1 %1178 }
 0x16a   :  { %2086 = vmatpush3.xpose.msk.msra.mxu0 %vm146_vm2, %v1009_v22  ;;  %2087 = vmatprep.mubr.msk.f32.mxu0 %vm2257_vm1, %v2256_v8 }
 0x16b   :  { %2095 = vmatprep.subr.mxu0 %v2256_v8 }
 0x16d   :  { %2088 = vmatmul.mubr.msk.f32.vlgmr.msra.gmra.mrb[8].mxu0 %vm146_vm2, %v1007_v23  ;;  %v1353_v25 = vpop.permute.xlu0 %1352  ;;  %v1351_v28 = vpop.permute.xlu1 %1350 }
 0x16e   :  { %2096 = vmatpush3.xpose.msk.msra.mxu0 %vm146_vm2, %v1181_v24  ;;  %2097 = vmatprep.mubr.msk.f32.mxu0 %vm2257_vm1, %v2256_v8 }
 0x16f   :  { %2105 = vmatprep.subr.mxu0 %v2256_v8 }
 0x171   :  { %2098 = vmatmul.mubr.msk.f32.vlgmr.msra.gmra.mrb[10].mxu0 %vm146_vm2, %v1179_v26  ;;  %v239_v27 = vpop.permute.xlu0 %238  ;;  %v2462_v10 = vpop.permute.xlu1 %406 }
 0x172   :  { %2041 = vmatpush3.msra.mxu1 %v239_v27  ;;  %2106 = vmatpush3.xpose.msk.msra.mxu0 %vm146_vm2, %v1353_v25 }
 0x173   :  { %2107 = vmatprep.mubr.msk.f32.mxu0 %vm2257_vm1, %v2256_v8  ;;  %2050 = vmatprep.subr.mxu1 %v2256_v8 }
 0x175   :  { %2108 = vmatmul.mubr.msk.f32.vlgmr.msra.gmra.mrb[12].mxu0 %vm146_vm2, %v1351_v28 }
 0x22c   :  { %v217_v29 = vpop.f32.mrb[2].mxu1 }
 0x22d   :  { %v221_v31 = vmul.f32 0.35355338, %v217_v29  ;;  %v2039_v32 = vpop.f32.mrb[3].mxu1 }
 0x22f   :  { %v226_v33 = vadd.f32 %v1927_v30, %v221_v31 }
 0x230   :  { %v389_v34 = vpop.f32.mrb[0].mxu0 }
 0x231   :  { %v393_v35 = vmul.f32 0.35355338, %v389_v34  ;;  %v2049_v36 = vpop.f32.mrb[1].mxu0  ;;  %v227_v37 = vsel %vm146_vm2, %v226_v33, -inf }
 0x232   :  { %228 = vmax.xlane.f32.xlu0 %v227_v37 }
 0x233   :  { %v394_v38 = vadd.f32 %v1927_v30, %v393_v35 }
 0x234   :  { %v562_v39 = vpop.f32.mrb[2].mxu0 }
 0x235   :  { %v566_v40 = vmul.f32 0.35355338, %v562_v39  ;;  %v2059_v41 = vpop.f32.mrb[3].mxu0  ;;  %v395_v42 = vsel %vm146_vm2, %v394_v38, -inf }
 0x236   :  { %396 = vmax.xlane.f32.xlu1 %v395_v42 }
 0x237   :  { %v567_v43 = vadd.f32 %v1927_v30, %v566_v40 }
 0x238   :  { %v735_v44 = vpop.f32.mrb[4].mxu0 }
 0x239   :  { %v739_v45 = vmul.f32 0.35355338, %v735_v44  ;;  %v2069_v46 = vpop.f32.mrb[5].mxu0  ;;  %v568_v47 = vsel %vm146_vm2, %v567_v43, -inf }
 0x23a   :  { %569 = vmax.xlane.f32.xlu0 %v568_v47 }
 0x23b   :  { %v740_v48 = vadd.f32 %v1927_v30, %v739_v45 }
 0x23c   :  { %v908_v49 = vpop.f32.mrb[6].mxu0 }
 0x23d   :  { %v912_v51 = vmul.f32 0.35355338, %v908_v49  ;;  %v2079_v52 = vpop.f32.mrb[7].mxu0  ;;  %v741_v53 = vsel %vm146_vm2, %v740_v48, -inf }
 0x23e   :  { %742 = vmax.xlane.f32.xlu0 %v741_v53 }
 0x23f   :  { %v917_v54 = vadd.f32 %v1940_v50, %v912_v51 }
 0x240   :  { %v1080_v55 = vpop.f32.mrb[8].mxu0 }
 0x241   :  { %v1084_v56 = vmul.f32 0.35355338, %v1080_v55  ;;  %v2089_v57 = vpop.f32.mrb[9].mxu0  ;;  %v918_v58 = vsel %vm146_vm2, %v917_v54, -inf }
 0x242   :  { %919 = vmax.xlane.f32.xlu1 %v918_v58 }
 0x243   :  { %v1085_v59 = vadd.f32 %v1940_v50, %v1084_v56 }
 0x244   :  { %v1252_v60 = vpop.f32.mrb[10].mxu0 }
 0x245   :  { %v1256_v61 = vmul.f32 0.35355338, %v1252_v60  ;;  %v2099_v62 = vpop.f32.mrb[11].mxu0  ;;  %v1086_v63 = vsel %vm146_vm2, %v1085_v59, -inf }
 0x246   :  { %1087 = vmax.xlane.f32.xlu0 %v1086_v63 }
 0x247   :  { %v1257_v0 = vadd.f32 %v1940_v50, %v1256_v61 }
 0x248   :  { %v1424_v1 = vpop.f32.mrb[12].mxu0 }
 0x249   :  { %v1428_v2 = vmul.f32 0.35355338, %v1424_v1  ;;  %v2109_v3 = vpop.f32.mrb[13].mxu0  ;;  %v1258_v4 = vsel %vm146_vm2, %v1257_v0, -inf }
 0x24a   :  { %1259 = vmax.xlane.f32.xlu1 %v1258_v4 }
 0x24b   :  { %v1429_v6 = vadd.f32 %v1940_v50, %v1428_v2 }
 0x24d   :  { %v1430_v9 = vsel %vm146_vm2, %v1429_v6, -inf }
 0x24e   :  { %1431 = vmax.xlane.f32.xlu0 %v1430_v9 }
 0x25b   :  { %752 = vrot.lane.b32.xlu1 %v2382_v12, %s2267_s1 }
 0x264   :  { %579 = vrot.lane.b32.xlu0 %v2382_v12, %s2268_s21 }
 0x2bf   :  { %v229_v11 = vpop.xlane.xlu0 %228 }
 0x2c0   :  { %v230_v14 = vsub.f32 %v226_v33, %v229_v11 }
 0x2c2   :  { %v231_v15 = vmul.f32 1.442695, %v230_v14 }
 0x2c3   :  { %v397_v16 = vpop.xlane.xlu1 %396 }
 0x2c4   :  { %2212 = vpow2.f32 %v231_v15  ;;  %v398_v17 = vsub.f32 %v394_v38, %v397_v16 }
 0x2c6   :  { %v399_v18 = vmul.f32 1.442695, %v398_v17 }
 0x2c7   :  { %v570_v19 = vpop.xlane.xlu0 %569 }
 0x2c8   :  { %2214 = vpow2.f32 %v399_v18  ;;  %v571_v20 = vsub.f32 %v567_v43, %v570_v19 }
 0x2ca   :  { %v572_v21 = vmul.f32 1.442695, %v571_v20 }
 0x2cb   :  { %v743_v22 = vpop.xlane.xlu0 %742 }
 0x2cc   :  { %2216 = vpow2.f32 %v572_v21  ;;  %v744_v23 = vsub.f32 %v740_v48, %v743_v22 }
 0x2ce   :  { %v2213_v24 = vpop.eup %2212  ;;  %v745_v25 = vmul.f32 1.442695, %v744_v23 }
 0x2cf   :  { %v233_v12 = vsel %vm146_vm2, %v2213_v24, 0.0  ;;  %v920_v32 = vpop.xlane.xlu1 %919 }
 0x2d0   :  { %2218 = vpow2.f32 %v745_v25  ;;  %234 = vadd.xlane.f32.xlu1 %v233_v12  ;;  %v921_v33 = vsub.f32 %v917_v54, %v920_v32 }
 0x2d2   :  { %v2215_v26 = vpop.eup %2214  ;;  %v922_v37 = vmul.f32 1.442695, %v921_v33  ;;  %v1526_v33 = vld [vmem:[%s2622_s4 + $0x10] sm:$0xff] }
 0x2d3   :  { %v401_v27 = vsel %vm146_vm2, %v2215_v26, 0.0  ;;  %v1088_v34 = vpop.xlane.xlu0 %1087 }
 0x2d4   :  { %402 = vadd.xlane.f32.xlu0 %v401_v27  ;;  %v1089_v36 = vsub.f32 %v1085_v59, %v1088_v34  ;;  %2220 = vpow2.f32 %v922_v37  ;;  %v1527_v34 = vld [vmem:[%s2622_s4 + $0x18] sm:$0xff] }
 0x2d6   :  { %v2217_v28 = vpop.eup %2216  ;;  %v1090_v40 = vmul.f32 1.442695, %v1089_v36 }
 0x2d7   :  { %v574_v29 = vsel %vm146_vm2, %v2217_v28, 0.0  ;;  %v1260_v35 = vpop.xlane.xlu1 %1259 }
 0x2d8   :  { %575 = vadd.xlane.f32.xlu1 %v574_v29  ;;  %v1261_v38 = vsub.f32 %v1257_v0, %v1260_v35  ;;  %2222 = vpow2.f32 %v1090_v40  ;;  %v1525_v29 = vld [vmem:[%s2622_s4 + $0x8] sm:$0xff]  ;;  %v2168_v35 = vpack.c.bf16 %v1527_v34, %v1526_v33  ;;  %v1777_v33 = vld [vmem:[%s2627_s10 + $0x20] sm:$0xff] }
 0x2d9   :  { %v1778_v34 = vld [vmem:[%s2627_s10 + $0x28] sm:$0xff] }
 0x2da   :  { %v2467_v30 = vpop.eup %2218  ;;  %v1262_v41 = vmul.f32 1.442695, %v1261_v38 }
 0x2db   :  { %v747_v31 = vsel %vm146_vm2, %v2467_v30, 0.0  ;;  %v1432_v39 = vpop.xlane.xlu0 %1431  ;;  %v753_v52 = vpop.permute.xlu1 %752 }
 0x2dc   :  { %748 = vadd.xlane.f32.xlu0 %v747_v31  ;;  %v1433_v42 = vsub.f32 %v1429_v6, %v1432_v39  ;;  %2224 = vpow2.f32 %v1262_v41 }
 0x2de   :  { %v1434_v43 = vmul.f32 1.442695, %v1433_v42  ;;  %v2221_v44 = vpop.eup %2220 }
 0x2df   :  { %v924_v46 = vsel %vm146_vm2, %v2221_v44, 0.0  ;;  %v580_v53 = vpop.permute.xlu0 %579 }
 0x2e0   :  { %2226 = vpow2.f32 %v1434_v43 }
 0x2e2   :  { %v2475_v45 = vpop.eup %2222 }
 0x2e3   :  { %v1092_v49 = vsel %vm146_vm2, %v2475_v45, 0.0 }
 0x2e6   :  { %v2478_v47 = vpop.eup %2224 }
 0x2e7   :  { %v1264_v48 = vsel %vm146_vm2, %v2478_v47, 0.0 }
 0x2e9   :  { %1097 = vrot.lane.b32.xlu1 %v2390_v13, %s2265_s15 }
 0x2ea   :  { %v2484_v50 = vpop.eup %2226 }
 0x2eb   :  { %v1436_v51 = vsel %vm146_vm2, %v2484_v50, 0.0 }
 0x2f2   :  { %929 = vrot.lane.b32.xlu0 %v2390_v13, %s2266_s16 }
 0x30d   :  { %925 = vadd.xlane.f32.xlu1 %v924_v46 }
 0x311   :  { %1265 = vadd.xlane.f32.xlu1 %v1264_v48  ;;  %1093 = vadd.xlane.f32.xlu0 %v1092_v49 }
 0x315   :  { %1437 = vadd.xlane.f32.xlu1 %v1436_v51 }
 0x326   :  { %1441 = vrot.lane.b32.xlu1 %v2390_v13, %s2267_s1 }
 0x327   :  { %1269 = vrot.lane.b32.xlu0 %v2390_v13, %s2268_s21 }
 0x35d   :  { %v235_v54 = vpop.xlane.xlu1 %234 }
 0x35e   :  { %2228 = vrcp.f32 %v235_v54 }
 0x361   :  { %v403_v55 = vpop.xlane.xlu0 %402 }
 0x362   :  { %2230 = vrcp.f32 %v403_v55 }
 0x365   :  { %v576_v56 = vpop.xlane.xlu1 %575 }
 0x366   :  { %2232 = vrcp.f32 %v576_v56 }
 0x368   :  { %v2229_v57 = vpop.eup %2228 }
 0x369   :  { %v237_v58 = vmul.f32 %v2229_v57, %v2213_v24  ;;  %v749_v59 = vpop.xlane.xlu0 %748  ;;  %v1098_v2 = vpop.permute.xlu1 %1097 }
 0x36a   :  { %2234 = vrcp.f32 %v749_v59 }
 0x36b   :  { %2043 = vmatmul.mubr.msk.f32.vlgmr.msra.gmra.mrb[4].mxu1 %vm146_vm2, %v237_v58 }
 0x36c   :  { %v2231_v60 = vpop.eup %2230  ;;  %2051 = vmatpush3.msra.mxu1 %v2462_v10  ;;  %2052 = vmatprep.mubr.msk.f32.mxu1 %vm2257_vm1, %v2256_v8 }
 0x36d   :  { %v405_v13 = vmul.f32 %v2231_v60, %v2215_v26  ;;  %2060 = vmatprep.subr.mxu1 %v2256_v8  ;;  %v930_v1 = vpop.permute.xlu0 %929 }
 0x36f   :  { %2053 = vmatmul.mubr.msk.f32.vlgmr.msra.gmra.mrb[6].mxu1 %vm146_vm2, %v405_v13 }
 0x370   :  { %v2233_v61 = vpop.eup %2232  ;;  %2061 = vmatpush3.msra.mxu1 %v580_v53  ;;  %2062 = vmatprep.mubr.msk.f32.mxu1 %vm2257_vm1, %v2256_v8 }
 0x371   :  { %v578_v62 = vmul.f32 %v2233_v61, %v2217_v28  ;;  %2070 = vmatprep.subr.mxu1 %v2256_v8  ;;  %v1524_v28 = vld [vmem:[%s2622_s4] sm:$0xff] }
 0x372   :  { %v2164_v31 = vpack.c.bf16 %v1525_v29, %v1524_v28  ;;  %v1774_v28 = vld [vmem:[%s2627_s10 + $0x8] sm:$0xff] }
 0x373   :  { %2063 = vmatmul.mubr.msk.f32.vlgmr.msra.gmra.mrb[8].mxu1 %vm146_vm2, %v578_v62 }
 0x374   :  { %v2235_v63 = vpop.eup %2234  ;;  %2071 = vmatpush3.msra.mxu1 %v753_v52  ;;  %2072 = vmatprep.mubr.msk.f32.mxu1 %vm2257_vm1, %v2256_v8 }
 0x375   :  { %v751_v0 = vmul.f32 %v2235_v63, %v2467_v30  ;;  %2080 = vmatprep.subr.mxu1 %v2256_v8  ;;  %2165 = vmatprep.subr.bf16.mxu0 %v2164_v31 }
 0x376   :  { %2167 = vmatpush3.bf16.msra.mxu0 %v2164_v31  ;;  %v1776_v31 = vld [vmem:[%s2627_s10 + $0x18] sm:$0xff] }
 0x377   :  { %2073 = vmatmul.mubr.msk.f32.vlgmr.msra.gmra.mrb[10].mxu1 %vm146_vm2, %v751_v0  ;;  %2169 = vmatprep.subr.bf16.mxu0 %v2168_v35 }
 0x378   :  { %2081 = vmatpush3.msra.mxu1 %v930_v1  ;;  %2082 = vmatprep.mubr.msk.f32.mxu1 %vm2257_vm1, %v2256_v8 }
 0x379   :  { %2090 = vmatprep.subr.mxu1 %v2256_v8 }
 0x37a   :  { %2171 = vmatpush3.bf16.msra.mxu0 %v2168_v35  ;;  %v2188_v35 = vpack.c.bf16 %v1778_v34, %v1777_v33 }
 0x39a   :  { %v926_v3 = vpop.xlane.xlu1 %925 }
 0x39b   :  { %2236 = vrcp.f32 %v926_v3  ;;  %v1664_v3 = vld [vmem:[%s2624_s8 + $0x8] sm:$0xff] }
 0x39e   :  { %v1266_v4 = vpop.xlane.xlu1 %1265  ;;  %v1094_v6 = vpop.xlane.xlu0 %1093 }
 0x39f   :  { %2238 = vrcp.f32 %v1094_v6  ;;  %v1665_v6 = vld [vmem:[%s2624_s8 + $0x10] sm:$0xff] }
 0x3a0   :  { %2240 = vrcp.f32 %v1266_v4 }
 0x3a2   :  { %v1438_v9 = vpop.xlane.xlu1 %1437  ;;  %v1270_v17 = vpop.permute.xlu0 %1269 }
 0x3a3   :  { %2242 = vrcp.f32 %v1438_v9  ;;  %v1666_v9 = vld [vmem:[%s2624_s8 + $0x18] sm:$0xff] }
 0x3a5   :  { %v2237_v10 = vpop.eup %2236 }
 0x3a6   :  { %v928_v11 = vmul.f32 %v2237_v10, %v2221_v44  ;;  %v1442_v20 = vpop.permute.xlu1 %1441  ;;  %v2176_v10 = vpack.c.bf16 %v1666_v9, %v1665_v6 }
 0x3a8   :  { %2083 = vmatmul.mubr.msk.f32.vlgmr.msra.gmra.mrb[12].mxu1 %vm146_vm2, %v928_v11 }
 0x3a9   :  { %2091 = vmatpush3.msra.mxu1 %v1098_v2  ;;  %2092 = vmatprep.mubr.msk.f32.mxu1 %vm2257_vm1, %v2256_v8  ;;  %v2239_v14 = vpop.eup %2238 }
 0x3aa   :  { %2100 = vmatprep.subr.mxu1 %v2256_v8  ;;  %v1096_v15 = vmul.f32 %v2239_v14, %v2475_v45  ;;  %v2241_v16 = vpop.eup %2240 }
 0x3ab   :  { %v1268_v18 = vmul.f32 %v2241_v16, %v2478_v47 }
 0x3ac   :  { %2093 = vmatmul.mubr.msk.f32.vlgmr.msra.gmra.mrb[14].mxu1 %vm146_vm2, %v1096_v15 }
 0x3ad   :  { %2101 = vmatpush3.msra.mxu1 %v1270_v17  ;;  %2102 = vmatprep.mubr.msk.f32.mxu1 %vm2257_vm1, %v2256_v8  ;;  %v2243_v19 = vpop.eup %2242 }
 0x3ae   :  { %2110 = vmatprep.subr.mxu1 %v2256_v8  ;;  %v1440_v21 = vmul.f32 %v2243_v19, %v2484_v50  ;;  %v1951_v50 = vld [vmem:[%s2623_s5] ss:$0 sm:$0xff] }
 0x3b0   :  { %2103 = vmatmul.mubr.msk.f32.vlgmr.msra.gmra.mrb[16].mxu1 %vm146_vm2, %v1268_v18 }
 0x3b1   :  { %2111 = vmatpush3.msra.mxu1 %v1442_v20  ;;  %2112 = vmatprep.mubr.msk.f32.mxu1 %vm2257_vm1, %v2256_v8  ;;  %v1954_v20 = vld [vmem:[%s2625_s6] ss:$0 sm:$0xff] }
 0x3b4   :  { %2113 = vmatmul.mubr.msk.f32.vlgmr.msra.gmra.mrb[18].mxu1 %vm146_vm2, %v1440_v21 }
 0x43e   :  { %v310_v22 = vpop.f32.mrb[4].mxu1 }
 0x43f   :  { %314 = vst.msk [vmem:[#allocation2] sm:$0xff] %vm146_vm2, %v310_v22  ;;  %v2044_v23 = vpop.f32.mrb[5].mxu1  ;;  %v1955_v22 = vld [vmem:[%s2626_s7] ss:$0 sm:$0xff] }
 0x442   :  { %v478_v24 = vpop.f32.mrb[6].mxu1 }
 0x443   :  { %483 = vrot.lane.b32.xlu0 %v478_v24, %s2269_s22  ;;  %v2054_v25 = vpop.f32.mrb[7].mxu1 }
 0x446   :  { %v651_v12 = vpop.f32.mrb[8].mxu1 }
 0x447   :  { %656 = vrot.lane.b32.xlu1 %v651_v12, %s2270_s23  ;;  %v2064_v26 = vpop.f32.mrb[9].mxu1 }
 0x44a   :  { %v824_v27 = vpop.f32.mrb[10].mxu1 }
 0x44b   :  { %829 = vrot.lane.b32.xlu1 %v824_v27, %s2271_s24  ;;  %v2074_v8 = vpop.f32.mrb[11].mxu1 }
 0x44c   :  { %v1773_v8 = vld [vmem:[%s2627_s10] sm:$0xff] }
 0x44d   :  { %v2180_v29 = vpack.c.bf16 %v1774_v28, %v1773_v8  ;;  %v1963_v8 = vld [vmem:[%s2631_s13] ss:$0 sm:$0xff] }
 0x44f   :  { %2181 = vmatprep.subr.bf16.mxu0 %v2180_v29 }
 0x47b   :  { %v1001_v30 = vpop.f32.mrb[12].mxu1 }
 0x47c   :  { %1005 = vst.msk [vmem:[#allocation2 + $0x8] sm:$0xff] %vm146_vm2, %v1001_v30  ;;  %v2084_v32 = vpop.f32.mrb[13].mxu1  ;;  %v1775_v30 = vld [vmem:[%s2627_s10 + $0x10] sm:$0xff] }
 0x47d   :  { %v2184_v32 = vpack.c.bf16 %v1776_v31, %v1775_v30 }
 0x47f   :  { %v1169_v36 = vpop.f32.mrb[14].mxu1 }
 0x480   :  { %1174 = vrot.lane.b32.xlu0 %v1169_v36, %s2269_s22  ;;  %v2094_v37 = vpop.f32.mrb[15].mxu1  ;;  %v1779_v36 = vld [vmem:[%s2627_s10 + $0x30] sm:$0xff] }
 0x481   :  { %v1780_v37 = vld [vmem:[%s2627_s10 + $0x38] sm:$0xff] }
 0x483   :  { %v1341_v38 = vpop.f32.mrb[16].mxu1 }
 0x484   :  { %1346 = vrot.lane.b32.xlu0 %v1341_v38, %s2270_s23  ;;  %v2104_v39 = vpop.f32.mrb[17].mxu1  ;;  %v2192_v38 = vpack.c.bf16 %v1780_v37, %v1779_v36 }
 0x485   :  { %v1956_v39 = vld [vmem:[%s2628_s9] ss:$0 sm:$0xff] }
 0x487   :  { %v1513_v40 = vpop.f32.mrb[18].mxu1 }
 0x488   :  { %1518 = vrot.lane.b32.xlu1 %v1513_v40, %s2271_s24  ;;  %v2114_v41 = vpop.f32.mrb[19].mxu1 }
 0x4b5   :  { %v484_v42 = vpop.permute.xlu0 %483 }
 0x4b6   :  { %487 = vst.msk [vmem:[#allocation2] sm:$0xff] %vm486_vm3, %v484_v42 }
 0x4b9   :  { %v657_v43 = vpop.permute.xlu1 %656 }
 0x4ba   :  { %660 = vst.msk [vmem:[#allocation2] sm:$0xff] %vm659_vm4, %v657_v43 }
 0x4bd   :  { %v830_v44 = vpop.permute.xlu1 %829 }
 0x4be   :  { %833 = vst.msk [vmem:[#allocation2] sm:$0xff] %vm832_vm5, %v830_v44 }
 0x4c5   :  { %v1522_v45 = vld [vmem:[#allocation2] sm:$0xff] }
 0x4c6   :  { %2123 = vmatprep.mubr.msk.f32.mxu0 %vm60_vm0, %v1522_v45 }
 0x4f2   :  { %v1175_v46 = vpop.permute.xlu0 %1174 }
 0x4f3   :  { %1177 = vst.msk [vmem:[#allocation2 + $0x8] sm:$0xff] %vm486_vm3, %v1175_v46 }
 0x4f6   :  { %v1347_v47 = vpop.permute.xlu0 %1346 }
 0x4f7   :  { %1349 = vst.msk [vmem:[#allocation2 + $0x8] sm:$0xff] %vm659_vm4, %v1347_v47 }
 0x4fa   :  { %v1519_v48 = vpop.permute.xlu1 %1518 }
 0x4fb   :  { %1521 = vst.msk [vmem:[#allocation2 + $0x8] sm:$0xff] %vm832_vm5, %v1519_v48 }
 0x502   :  { %v1523_v49 = vld [vmem:[#allocation2 + $0x8] sm:$0xff] }
 0x503   :  { %2124 = vmatmul.mubr.msk.f32.vlgmr.msra.gmra.mrb[14].mxu0 %vm60_vm0, %v1523_v49 }
 0x504   :  { %2183 = vmatpush3.bf16.msra.mxu0 %v2180_v29 }
 0x505   :  { %2185 = vmatprep.subr.bf16.mxu0 %v2184_v32 }
 0x508   :  { %2187 = vmatpush3.bf16.msra.mxu0 %v2184_v32 }
 0x509   :  { %2189 = vmatprep.subr.bf16.mxu0 %v2188_v35 }
 0x50c   :  { %2191 = vmatpush3.bf16.msra.mxu0 %v2188_v35 }
 0x50d   :  { %2193 = vmatprep.subr.bf16.mxu0 %v2192_v38 }
 0x510   :  { %2195 = vmatpush3.bf16.msra.mxu0 %v2192_v38 }
 0x5d6   :  { %v2125_v51 = vpop.f32.mrb[14].mxu0 }
 0x5d7   :  { %v1613_v52 = vadd.f32 %v2125_v51, %v1951_v50  ;;  %v1607_v53 = vpop.f32.mrb[15].mxu0 }
 0x5d8   :  { %v1608_v54 = vadd.f32 %v1951_v50, %v1607_v53 }
 0x5d9   :  { %v1617_v55 = vadd.f32 %v1613_v52, %v2369_v7 }
 0x5da   :  { %v1616_v56 = vadd.f32 %v1608_v54, %v2362_v5  ;;  %v1663_v5 = vld [vmem:[%s2624_s8] sm:$0xff] }
 0x5db   :  { %v1623_v57 = vsel %vm60_vm0, %v1617_v55, 0.0  ;;  %v2172_v4 = vpack.c.bf16 %v1664_v3, %v1663_v5 }
 0x5dc   :  { %1624 = vadd.xlane.f32.xlu1 %v1623_v57  ;;  %v1620_v58 = vsel %vm60_vm0, %v1616_v56, 0.0 }
 0x5dd   :  { %1621 = vadd.xlane.f32.xlu0 %v1620_v58  ;;  %2173 = vmatprep.subr.bf16.mxu1 %v2172_v4 }
 0x5de   :  { %2175 = vmatpush3.bf16.msra.mxu1 %v2172_v4 }
 0x5df   :  { %2177 = vmatprep.subr.bf16.mxu1 %v2176_v10 }
 0x5e2   :  { %2179 = vmatpush3.bf16.msra.mxu1 %v2176_v10 }
 0x669   :  { %v1625_v59 = vpop.xlane.xlu1 %1624 }
 0x66a   :  { %v1628_v60 = vmul.f32 0.03125, %v1625_v59  ;;  %v1622_v13 = vpop.xlane.xlu0 %1621 }
 0x66b   :  { %v1627_v61 = vmul.f32 0.03125, %v1622_v13 }
 0x66c   :  { %v1630_v62 = vsub.f32 %v1617_v55, %v1628_v60 }
 0x66d   :  { %v1629_v63 = vsub.f32 %v1616_v56, %v1627_v61  ;;  %v1959_v61 = vld [vmem:[%s2629_s11] ss:$0 sm:$0xff] }
 0x66e   :  { %v1632_v2 = vmul.f32 %v1630_v62, %v1630_v62 }
 0x66f   :  { %v1631_v0 = vmul.f32 %v1629_v63, %v1629_v63 }
 0x670   :  { %v1636_v7 = vsel %vm60_vm0, %v1632_v2, 0.0 }
 0x671   :  { %v1633_v1 = vsel %vm60_vm0, %v1631_v0, 0.0 }
 0x672   :  { %1634 = vadd.xlane.f32.xlu0 %v1633_v1 }
 0x676   :  { %1637 = vadd.xlane.f32.xlu0 %v1636_v7 }
 0x6ff   :  { %v1635_v11 = vpop.xlane.xlu0 %1634 }
 0x700   :  { %v1639_v14 = vmul.f32 0.03125, %v1635_v11 }
 0x702   :  { %v1641_v15 = vadd.f32 1e-12, %v1639_v14 }
 0x703   :  { %v1638_v16 = vpop.xlane.xlu0 %1637 }
 0x704   :  { %2244 = vrsqrt.f32 %v1641_v15  ;;  %v1640_v17 = vmul.f32 0.03125, %v1638_v16 }
 0x706   :  { %v1642_v18 = vadd.f32 1e-12, %v1640_v17 }
 0x708   :  { %2246 = vrsqrt.f32 %v1642_v18 }
 0x70e   :  { %v2245_v19 = vpop.eup %2244 }
 0x70f   :  { %v1645_v21 = vmul.f32 %v2245_v19, %v1629_v63 }
 0x711   :  { %v1653_v23 = vmul.f32 %v1954_v20, %v1645_v21 }
 0x712   :  { %v2247_v24 = vpop.eup %2246 }
 0x713   :  { %v1646_v25 = vmul.f32 %v2247_v24, %v1630_v62  ;;  %v1661_v12 = vadd.f32 %v1955_v22, %v1653_v23 }
 0x715   :  { %v1654_v26 = vmul.f32 %v1954_v20, %v1646_v25  ;;  %2134 = vmatprep.mubr.msk.f32.mxu1 %vm60_vm0, %v1661_v12 }
 0x717   :  { %v1662_v27 = vadd.f32 %v1955_v22, %v1654_v26 }
 0x719   :  { %2135 = vmatmul.mubr.msk.f32.vlgmr.msra.gmra.mrb[20].mxu1 %vm60_vm0, %v1662_v27 }
 0x7ec   :  { %v2136_v40 = vpop.f32.mrb[20].mxu1 }
 0x7ed   :  { %v1752_v41 = vadd.f32 %v2136_v40, %v1956_v39  ;;  %v1746_v42 = vpop.f32.mrb[21].mxu1 }
 0x7ee   :  { %v1747_v43 = vadd.f32 %v1956_v39, %v1746_v42 }
 0x7ef   :  { %v1758_v44 = vmul.f32 0.044715, %v1752_v41  ;;  %v1756_v59 = vmul.f32 0.5, %v1752_v41 }
 0x7f0   :  { %v1757_v45 = vmul.f32 0.044715, %v1747_v43  ;;  %v1755_v57 = vmul.f32 0.5, %v1747_v43 }
 0x7f1   :  { %v1760_v46 = vmul.f32 %v1758_v44, %v1752_v41 }
 0x7f2   :  { %v1759_v47 = vmul.f32 %v1757_v45, %v1747_v43 }
 0x7f3   :  { %v1762_v48 = vmul.f32 %v1760_v46, %v1752_v41 }
 0x7f4   :  { %v1761_v49 = vmul.f32 %v1759_v47, %v1747_v43 }
 0x7f5   :  { %v1764_v50 = vadd.f32 %v1762_v48, %v1752_v41 }
 0x7f6   :  { %v1763_v51 = vadd.f32 %v1761_v49, %v1747_v43 }
 0x7f7   :  { %v1766_v52 = vmul.f32 0.7978845, %v1764_v50 }
 0x7f8   :  { %v1765_v53 = vmul.f32 0.7978845, %v1763_v51 }
 0x7f9   :  { %2248 = vtanh.f32 %v1766_v52 }
 0x7fa   :  { %2250 = vtanh.f32 %v1765_v53 }
 0x803   :  { %v2249_v54 = vpop.eup %2248 }
 0x804   :  { %v2251_v55 = vpop.eup %2250  ;;  %v1770_v56 = vadd.f32 1.0, %v2249_v54 }
 0x805   :  { %v1769_v58 = vadd.f32 1.0, %v2251_v55 }
 0x806   :  { %v1772_v13 = vmul.f32 %v1770_v56, %v1756_v59 }
 0x807   :  { %v1771_v60 = vmul.f32 %v1769_v58, %v1755_v57 }
 0x809   :  { %2153 = vmatprep.mubr.msk.f32.mxu0 %vm1788_vm6, %v1771_v60 }
 0x80a   :  { %2154 = vmatmul.mubr.msk.f32.vlgmr.msra.gmra.mrb[16].mxu0 %vm1788_vm6, %v1772_v13 }
 0x8dd   :  { %v2155_v62 = vpop.f32.mrb[16].mxu0 }
 0x8de   :  { %v1867_v63 = vadd.f32 %v2155_v62, %v1959_v61  ;;  %v1861_v0 = vpop.f32.mrb[17].mxu0 }
 0x8df   :  { %v1862_v1 = vadd.f32 %v1959_v61, %v1861_v0 }
 0x8e0   :  { %v1871_v2 = vadd.f32 %v1867_v63, %v1662_v27 }
 0x8e1   :  { %v1870_v7 = vadd.f32 %v1862_v1, %v1661_v12  ;;  %v1962_v12 = vld [vmem:[%s2630_s12] ss:$0 sm:$0xff] }
 0x8e2   :  { %v1877_v5 = vsel %vm60_vm0, %v1871_v2, 0.0 }
 0x8e3   :  { %1878 = vadd.xlane.f32.xlu0 %v1877_v5  ;;  %v1874_v3 = vsel %vm60_vm0, %v1870_v7, 0.0 }
 0x8e4   :  { %1875 = vadd.xlane.f32.xlu1 %v1874_v3 }
 0x970   :  { %v1879_v4 = vpop.xlane.xlu0 %1878 }
 0x971   :  { %v1881_v6 = vmul.f32 0.03125, %v1879_v4  ;;  %v1876_v9 = vpop.xlane.xlu1 %1875 }
 0x972   :  { %v1880_v10 = vmul.f32 0.03125, %v1876_v9 }
 0x973   :  { %v1883_v11 = vsub.f32 %v1871_v2, %v1881_v6 }
 0x974   :  { %v1882_v14 = vsub.f32 %v1870_v7, %v1880_v10 }
 0x975   :  { %v1885_v15 = vmul.f32 %v1883_v11, %v1883_v11 }
 0x976   :  { %v1884_v16 = vmul.f32 %v1882_v14, %v1882_v14 }
 0x977   :  { %v1889_v17 = vsel %vm60_vm0, %v1885_v15, 0.0 }
 0x978   :  { %1890 = vadd.xlane.f32.xlu0 %v1889_v17  ;;  %v1886_v18 = vsel %vm60_vm0, %v1884_v16, 0.0 }
 0x979   :  { %1887 = vadd.xlane.f32.xlu1 %v1886_v18 }
 0xa05   :  { %v1891_v19 = vpop.xlane.xlu0 %1890 }
 0xa06   :  { %v1893_v20 = vmul.f32 0.03125, %v1891_v19  ;;  %v1888_v21 = vpop.xlane.xlu1 %1887 }
 0xa07   :  { %v1892_v22 = vmul.f32 0.03125, %v1888_v21 }
 0xa08   :  { %v1895_v23 = vadd.f32 1e-12, %v1893_v20 }
 0xa09   :  { %v1894_v24 = vadd.f32 1e-12, %v1892_v22 }
 0xa0a   :  { %2252 = vrsqrt.f32 %v1895_v23 }
 0xa0b   :  { %2254 = vrsqrt.f32 %v1894_v24 }
 0xa14   :  { %v2253_v25 = vpop.eup %2252 }
 0xa15   :  { %v2255_v26 = vpop.eup %2254  ;;  %v1899_v27 = vmul.f32 %v2253_v25, %v1883_v11 }
 0xa16   :  { %v1898_v28 = vmul.f32 %v2255_v26, %v1882_v14 }
 0xa17   :  { %v1907_v29 = vmul.f32 %v1962_v12, %v1899_v27 }
 0xa18   :  { %v1906_v30 = vmul.f32 %v1962_v12, %v1898_v28 }
 0xa19   :  { %v1915_v31 = vadd.f32 %v1963_v8, %v1907_v29 }
 0xa1a   :  { %v1914_v32 = vadd.f32 %v1963_v8, %v1906_v30 }
 0xa1b   :  { %1917 = vst.msk [vmem:[%s2632_s14 + $0x8] sm:$0xff] %vm60_vm0, %v1915_v31 }
 0xa1c   :  { %1916 = vst.msk [vmem:[%s2632_s14] sm:$0xff] %vm60_vm0, %v1914_v32 }

</bundles_post_ra>
